<compile_context>
chip_gen: v5e
topology: v5e:2x2
jax: 0.10.0
libtpu: 0.0.40
codegen_flags: <defaults>
</compile_context>

<pallas_src>
import functools

import jax
import jax.numpy as jnp
from jax.experimental import pallas as pl
from jax.experimental.pallas import tpu as pltpu

INPUT_SZ = 32 * 32 * 3      # 3072, fixed by the module's forward()
HIDDEN_DIM = 64
N_CLASSES = 10
LANES = 128
SUBLANES = 16               # bf16 sublane packing -> keep batch tiles 16-aligned


def _round_up(x, m):
    return (x + m - 1) // m * m


def _mlp_kernel(x_ref, w1_ref, w2_ref, w3_ref, w4_ref, b_ref, o_ref):
    """Fused 4-layer MLP, ReLU between layers (no ReLU on the classifier)."""
    d1 = w1_ref.shape[1]
    d2 = w2_ref.shape[1]
    d3 = w3_ref.shape[1]
    d4 = w4_ref.shape[1]

    # Layer 1 carries ~96% of the FLOPs and all HBM traffic that matters
    # (TB x 3072 @ 3072 x 2h).  x / w1 may be bf16; the MXU accumulates in f32.
    h = jnp.dot(x_ref[...], w1_ref[...], preferred_element_type=jnp.float32)
    h = jnp.maximum(h + b_ref[0:1, 0:d1], 0.0)                         # (TB, 2h)

    # Layers 2-4 are FLOP-trivial; keep them fused, f32, entirely in vregs —
    # no extra pallas_calls or HBM round-trips for intermediates.
    h = jnp.maximum(
        jnp.dot(h, w2_ref[...], preferred_element_type=jnp.float32)
        + b_ref[1:2, 0:d2], 0.0)
    h = jnp.maximum(
        jnp.dot(h, w3_ref[...], preferred_element_type=jnp.float32)
        + b_ref[2:3, 0:d3], 0.0)
    o = (jnp.dot(h, w4_ref[...], preferred_element_type=jnp.float32)
         + b_ref[3:4, 0:d4])
    o_ref[...] = o.astype(o_ref.dtype)                                 # (TB, 128)


def base_model_forward(x_nchw, params, *, batch_tile=1024,
                       compute_dtype=jnp.bfloat16):
    """Runs BaseModel.forward on NCHW input (B, 3, 32, 32). Returns (B, n_classes)."""
    B = x_nchw.shape[0]
    # torch's .view(-1, 3072): reshape is layout-free; cast straight to the
    # compute dtype in one pass (a no-op if the caller already supplies bf16).
    x = x_nchw.reshape(B, -1).astype(compute_dtype)
    assert x.shape[1] == INPUT_SZ

    (w1, b1), (w2, b2), (w3, b3), (w4, b4) = params
    d1, d2, d3 = w1.shape[1], w2.shape[1], w3.shape[1]
    n_classes = w4.shape[1]
    n_out_pad = _round_up(max(n_classes, LANES), LANES)

    # Lane-dense classifier: pad to a 128-lane multiple.  Padded columns are
    # exact zeros (zero weight column + zero bias) and are sliced off below.
    w4p = jnp.zeros((d3, n_out_pad), jnp.float32).at[:, :n_classes].set(
        w4.astype(jnp.float32))

    # Merge the four biases into one (8, Wb) f32 block: one DMA descriptor and
    # one VMEM tile instead of four separately padded (1, N) tiles.
    wb = _round_up(max(d1, d2, d3, n_out_pad), LANES)
    b_all = jnp.zeros((8, wb), jnp.float32)
    b_all = b_all.at[0, :d1].set(b1.reshape(-1).astype(jnp.float32))
    b_all = b_all.at[1, :d2].set(b2.reshape(-1).astype(jnp.float32))
    b_all = b_all.at[2, :d3].set(b3.reshape(-1).astype(jnp.float32))
    b_all = b_all.at[3, :n_classes].set(b4.reshape(-1).astype(jnp.float32))

    # bf16 on the dominant layer-1 weight; layers 2-4 stay f32 (tiny).
    w1_c = w1.astype(compute_dtype)
    w2_f = w2.astype(jnp.float32)
    w3_f = w3.astype(jnp.float32)

    # Batch tiling without padding x: the ragged last grid block reads
    # undefined rows (each output row depends only on its own input row) and
    # its out-of-range output rows are dropped by Pallas.  Only tiny batches
    # (< 16 rows) get padded so the block shape is a legal bf16 tile.
    if B < SUBLANES:
        B_work = SUBLANES
        x = jnp.pad(x, ((0, B_work - B), (0, 0)))   # <= 15 rows, negligible
    else:
        B_work = B

    n_tiles = max(1, pl.cdiv(B_work, batch_tile))
    if n_tiles == 1 and B_work >= 512:
        n_tiles = 2            # keep both v7x TensorCores busy for big batches
    tb = _round_up(pl.cdiv(B_work, n_tiles), SUBLANES)
    tb = min(tb, (B_work // SUBLANES) * SUBLANES)    # never exceed array rows
    tb = max(tb, SUBLANES)
    grid = (pl.cdiv(B_work, tb),)

    x_item = jnp.dtype(compute_dtype).itemsize
    const_bytes = (w1_c.size * x_item
                   + (w2_f.size + w3_f.size + w4p.size + b_all.size) * 4)
    vmem_bytes = (2 * tb * INPUT_SZ * x_item          # x tile, double-buffered
                  + 2 * tb * n_out_pad * x_item       # output tile, double-buffered
                  + 2 * const_bytes                   # resident weights (2 bufs)
                  + (4 << 20))                        # scratch / vreg slack
    vmem_limit = int(min(max(vmem_bytes, 32 << 20), 64 << 20))

    rows = grid[0] * tb
    flops = 2 * rows * (INPUT_SZ * d1 + d1 * d2 + d2 * d3 + d3 * n_out_pad)
    bytes_accessed = (rows * INPUT_SZ * x_item
                      + const_bytes
                      + rows * n_out_pad * x_item)

    def const_spec(shape):
        # Whole array resident in VMEM; same block for every batch tile.
        return pl.BlockSpec(shape, lambda i: (0, 0))

    out = pl.pallas_call(
        _mlp_kernel,
        out_shape=jax.ShapeDtypeStruct((B_work, n_out_pad), compute_dtype),
        grid_spec=pltpu.PrefetchScalarGridSpec(
            num_scalar_prefetch=0,
            grid=grid,
            in_specs=[
                pl.BlockSpec((tb, INPUT_SZ), lambda i: (i, 0)),   # x batch tile
                const_spec(w1_c.shape),
                const_spec(w2_f.shape),
                const_spec(w3_f.shape),
                const_spec(w4p.shape),
                const_spec(b_all.shape),
            ],
            out_specs=pl.BlockSpec((tb, n_out_pad), lambda i: (i, 0)),
        ),
        compiler_params=pltpu.CompilerParams(
            dimension_semantics=("parallel",),     # shard batch tiles across TCs
            vmem_limit_bytes=vmem_limit),
        cost_estimate=pl.CostEstimate(
            flops=int(flops), transcendentals=0,
            bytes_accessed=int(bytes_accessed)),
    )(x, w1_c, w2_f, w3_f, w4p, b_all)

    return out[:B, :n_classes]


def init_params(key, input_sz=INPUT_SZ, hidden_dim=HIDDEN_DIM, n_classes=N_CLASSES):
    """Init mimicking nn.Linear defaults (uniform +/- 1/sqrt(fan_in)).

    Weights are stored TRANSPOSED, i.e. shape (in_features, out_features),
    so the kernel can do x @ W directly.  Biases are (1, out_features).
    """
    dims = [input_sz, hidden_dim * 2, hidden_dim, hidden_dim // 2, n_classes]
    params = []
    for fan_in, fan_out in zip(dims[:-1], dims[1:]):
        key, kw, kb = jax.random.split(key, 3)
        bound = 1.0 / jnp.sqrt(jnp.float32(fan_in))
        w = jax.random.uniform(kw, (fan_in, fan_out), jnp.float32, -bound, bound)
        b = jax.random.uniform(kb, (1, fan_out), jnp.float32, -bound, bound)
        params.append((w, b))
    return params


def _reference_forward(x_nchw, params):
    x = x_nchw.reshape(x_nchw.shape[0], -1)
    (w1, b1), (w2, b2), (w3, b3), (w4, b4) = params
    h = jnp.maximum(x @ w1 + b1, 0.0)
    h = jnp.maximum(h @ w2 + b2, 0.0)
    h = jnp.maximum(h @ w3 + b3, 0.0)
    return h @ w4 + b4


if __name__ == "__main__":
    key = jax.random.PRNGKey(0)
    k_in, k_params = jax.random.split(key)

    B = 4
    x = jax.random.normal(k_in, (B, 3, 32, 32), jnp.float32)   # NCHW, like PyTorch
    params = init_params(k_params)
    ref = _reference_forward(x, params)

    # Exact path: f32 end-to-end through the kernel -> tight tolerance.
    fwd_f32 = jax.jit(functools.partial(base_model_forward,
                                        compute_dtype=jnp.float32))
    out_f32 = jax.block_until_ready(fwd_f32(x, params))
    assert out_f32.shape == (B, N_CLASSES)
    assert jnp.allclose(out_f32, ref, atol=1e-4, rtol=1e-4), "f32 path mismatch"

    # Fast path: bf16 x / w1 / output with f32 MXU accumulation -> loose tol.
    fwd_fast = jax.jit(base_model_forward)
    out_fast = jax.block_until_ready(fwd_fast(x, params))
    assert out_fast.shape == (B, N_CLASSES)
    assert jnp.allclose(out_fast.astype(jnp.float32), ref,
                        atol=5e-2, rtol=5e-2), "bf16 path mismatch"

    # Ragged multi-tile grid: 2 batch tiles, last one partially out of range
    # (exercises the no-pad / masked-writeback path).
    B2 = 20
    x2 = jax.random.normal(jax.random.PRNGKey(1), (B2, 3, 32, 32), jnp.float32)
    ref2 = _reference_forward(x2, params)
    fwd_ragged = jax.jit(functools.partial(base_model_forward, batch_tile=16))
    out2 = jax.block_until_ready(fwd_ragged(x2, params))
    assert out2.shape == (B2, N_CLASSES)
    assert jnp.allclose(out2.astype(jnp.float32), ref2,
                        atol=5e-2, rtol=5e-2), "ragged-grid path mismatch"

    print("KERNEL_OK")
</pallas_src>

<mosaic_0001>
module attributes {stable_mosaic.version = 11 : i64} {
  func.func @_mlp_kernel(%arg0: i32, %arg1: memref<16x3072xf32, #tpu.memory_space<vmem>>, %arg2: memref<3072x128xf32, #tpu.memory_space<vmem>>, %arg3: memref<128x64xf32, #tpu.memory_space<vmem>>, %arg4: memref<64x32xf32, #tpu.memory_space<vmem>>, %arg5: memref<32x128xf32, #tpu.memory_space<vmem>>, %arg6: memref<8x128xf32, #tpu.memory_space<vmem>>, %arg7: memref<16x128xf32, #tpu.memory_space<vmem>>) attributes {dimension_semantics = [#tpu.dimension_semantics<parallel>], iteration_bounds = array<i64: 1>, scalar_prefetch = 0 : i64, scratch_operands = 0 : i64, tpu.core_type = #tpu.core_type<tc>, window_params = [{transform_indices = @transform_0, window_bounds = array<i64: 16, 3072>}, {pipeline_mode = #tpu.pipeline_mode<synchronous>, transform_indices = @transform_1, window_bounds = array<i64: 3072, 128>}, {pipeline_mode = #tpu.pipeline_mode<synchronous>, transform_indices = @transform_2, window_bounds = array<i64: 128, 64>}, {pipeline_mode = #tpu.pipeline_mode<synchronous>, transform_indices = @transform_3, window_bounds = array<i64: 64, 32>}, {pipeline_mode = #tpu.pipeline_mode<synchronous>, transform_indices = @transform_4, window_bounds = array<i64: 32, 128>}, {pipeline_mode = #tpu.pipeline_mode<synchronous>, transform_indices = @transform_5, window_bounds = array<i64: 8, 128>}, {transform_indices = @transform_6, window_bounds = array<i64: 16, 128>}]} {
    %c0 = arith.constant 0 : index
    %c0_0 = arith.constant 0 : index
    %0 = vector.load %arg1[%c0, %c0_0] : memref<16x3072xf32, #tpu.memory_space<vmem>>, vector<16x3072xf32>
    %c0_1 = arith.constant 0 : index
    %c0_2 = arith.constant 0 : index
    %1 = vector.load %arg2[%c0_1, %c0_2] : memref<3072x128xf32, #tpu.memory_space<vmem>>, vector<3072x128xf32>
    %cst = arith.constant dense<0.000000e+00> : vector<16x128xf32>
    %2 = tpu.matmul %0, %1, %cst {dimension_numbers = #tpu.dot_dimension_numbers<[1], [0], [0], [1], [0, 0, 1, 1], [], []>} : vector<16x3072xf32>, vector<3072x128xf32>, vector<16x128xf32> -> vector<16x128xf32>
    %c0_3 = arith.constant 0 : index
    %c0_4 = arith.constant 0 : index
    %3 = vector.load %arg6[%c0_3, %c0_4] : memref<8x128xf32, #tpu.memory_space<vmem>>, vector<1x128xf32>
    %4 = vector.broadcast %3 : vector<1x128xf32> to vector<16x128xf32>
    %5 = arith.addf %2, %4 : vector<16x128xf32>
    %cst_5 = arith.constant 0.000000e+00 : f32
    %6 = vector.broadcast %cst_5 : f32 to vector<16x128xf32>
    %7 = arith.maximumf %5, %6 : vector<16x128xf32>
    %c0_6 = arith.constant 0 : index
    %c0_7 = arith.constant 0 : index
    %8 = vector.load %arg3[%c0_6, %c0_7] : memref<128x64xf32, #tpu.memory_space<vmem>>, vector<128x64xf32>
    %cst_8 = arith.constant dense<0.000000e+00> : vector<16x64xf32>
    %9 = tpu.matmul %7, %8, %cst_8 {dimension_numbers = #tpu.dot_dimension_numbers<[1], [0], [0], [1], [0, 0, 1, 1], [], []>} : vector<16x128xf32>, vector<128x64xf32>, vector<16x64xf32> -> vector<16x64xf32>
    %c1 = arith.constant 1 : index
    %c0_9 = arith.constant 0 : index
    %10 = vector.load %arg6[%c1, %c0_9] : memref<8x128xf32, #tpu.memory_space<vmem>>, vector<1x64xf32>
    %11 = vector.broadcast %10 : vector<1x64xf32> to vector<16x64xf32>
    %12 = arith.addf %9, %11 : vector<16x64xf32>
    %cst_10 = arith.constant 0.000000e+00 : f32
    %13 = vector.broadcast %cst_10 : f32 to vector<16x64xf32>
    %14 = arith.maximumf %12, %13 : vector<16x64xf32>
    %c0_11 = arith.constant 0 : index
    %c0_12 = arith.constant 0 : index
    %15 = vector.load %arg4[%c0_11, %c0_12] : memref<64x32xf32, #tpu.memory_space<vmem>>, vector<64x32xf32>
    %cst_13 = arith.constant dense<0.000000e+00> : vector<16x32xf32>
    %16 = tpu.matmul %14, %15, %cst_13 {dimension_numbers = #tpu.dot_dimension_numbers<[1], [0], [0], [1], [0, 0, 1, 1], [], []>} : vector<16x64xf32>, vector<64x32xf32>, vector<16x32xf32> -> vector<16x32xf32>
    %c2 = arith.constant 2 : index
    %c0_14 = arith.constant 0 : index
    %17 = vector.load %arg6[%c2, %c0_14] : memref<8x128xf32, #tpu.memory_space<vmem>>, vector<1x32xf32>
    %18 = vector.broadcast %17 : vector<1x32xf32> to vector<16x32xf32>
    %19 = arith.addf %16, %18 : vector<16x32xf32>
    %cst_15 = arith.constant 0.000000e+00 : f32
    %20 = vector.broadcast %cst_15 : f32 to vector<16x32xf32>
    %21 = arith.maximumf %19, %20 : vector<16x32xf32>
    %c0_16 = arith.constant 0 : index
    %c0_17 = arith.constant 0 : index
    %22 = vector.load %arg5[%c0_16, %c0_17] : memref<32x128xf32, #tpu.memory_space<vmem>>, vector<32x128xf32>
    %cst_18 = arith.constant dense<0.000000e+00> : vector<16x128xf32>
    %23 = tpu.matmul %21, %22, %cst_18 {dimension_numbers = #tpu.dot_dimension_numbers<[1], [0], [0], [1], [0, 0, 1, 1], [], []>} : vector<16x32xf32>, vector<32x128xf32>, vector<16x128xf32> -> vector<16x128xf32>
    %c3 = arith.constant 3 : index
    %c0_19 = arith.constant 0 : index
    %24 = vector.load %arg6[%c3, %c0_19] : memref<8x128xf32, #tpu.memory_space<vmem>>, vector<1x128xf32>
    %25 = vector.broadcast %24 : vector<1x128xf32> to vector<16x128xf32>
    %26 = arith.addf %23, %25 : vector<16x128xf32>
    %c0_20 = arith.constant 0 : index
    %c0_21 = arith.constant 0 : index
    %27 = vector.load %arg7[%c0_20, %c0_21] : memref<16x128xf32, #tpu.memory_space<vmem>>, vector<16x128xf32>
    tpu.vector_store %arg7[%c0_20, %c0_21], %26 {strides = array<i32>} : memref<16x128xf32, #tpu.memory_space<vmem>>, vector<16x128xf32>,
    return
  }
  func.func @transform_0(%arg0: i32) -> (i32, i32) {
    %c0_i32 = arith.constant 0 : i32
    %c0_i32_0 = arith.constant 0 : i32
    return %arg0, %c0_i32 : i32, i32
  }
  func.func @transform_1(%arg0: i32) -> (i32, i32) {
    %c0_i32 = arith.constant 0 : i32
    %c0_i32_0 = arith.constant 0 : i32
    %c0_i32_1 = arith.constant 0 : i32
    return %c0_i32, %c0_i32_0 : i32, i32
  }
  func.func @transform_2(%arg0: i32) -> (i32, i32) {
    %c0_i32 = arith.constant 0 : i32
    %c0_i32_0 = arith.constant 0 : i32
    %c0_i32_1 = arith.constant 0 : i32
    return %c0_i32, %c0_i32_0 : i32, i32
  }
  func.func @transform_3(%arg0: i32) -> (i32, i32) {
    %c0_i32 = arith.constant 0 : i32
    %c0_i32_0 = arith.constant 0 : i32
    %c0_i32_1 = arith.constant 0 : i32
    return %c0_i32, %c0_i32_0 : i32, i32
  }
  func.func @transform_4(%arg0: i32) -> (i32, i32) {
    %c0_i32 = arith.constant 0 : i32
    %c0_i32_0 = arith.constant 0 : i32
    %c0_i32_1 = arith.constant 0 : i32
    return %c0_i32, %c0_i32_0 : i32, i32
  }
  func.func @transform_5(%arg0: i32) -> (i32, i32) {
    %c0_i32 = arith.constant 0 : i32
    %c0_i32_0 = arith.constant 0 : i32
    %c0_i32_1 = arith.constant 0 : i32
    return %c0_i32, %c0_i32_0 : i32, i32
  }
  func.func @transform_6(%arg0: i32) -> (i32, i32) {
    %c0_i32 = arith.constant 0 : i32
    %c0_i32_0 = arith.constant 0 : i32
    return %arg0, %c0_i32 : i32, i32
  }
}

</mosaic_0001>

<bundles_post_ra>
// kernel: base_model_forward.1
= control target key start
LH: loop header
LB: loop body
LE: loop exit
PB: predicated region body
PF: predicated region fallthrough
CT: control target
= control target key end

     0   :  { %11 = vsyncpa [#allocation3], 0  ;;  %s1208_s24 = smov [#allocation2]   ;;  %s1209_s26 = smov 128   ;;  %s1495_s0 = inlined_call_operand.vmem [shape: f32[16,3072], index: 0, kind: input, shape index: {}]   ;;  %s1496_s1 = inlined_call_operand.hbm [shape: f32[3072,128], index: 1, kind: input, shape index: {}]   ;;  %s1497_s2 = inlined_call_operand.vmem [shape: f32[128,64], index: 2, kind: input, shape index: {}]   ;;  %s1498_s3 = inlined_call_operand.vmem [shape: f32[64,32], index: 3, kind: input, shape index: {}]   ;;  %s1499_s4 = inlined_call_operand.vmem [shape: f32[32,128], index: 4, kind: input, shape index: {}]   ;;  %s1500_s5 = inlined_call_operand.vmem [shape: f32[8,128], index: 5, kind: input, shape index: {}]   ;;  %s1501_s6 = inlined_call_operand.vmem [shape: f32[16,128], index: 6, kind: output, shape index: {}]  }
   0x1   :  { %s18_s23 = sshll.u32 %s1496_s1, 4  ;;  %s20_s25 = sshll.u32 %s1208_s24, 4  ;;  %s19_s23 = int_to_ptr.hbm [resolvable:$true] %s18_s23  ;;  %s21_s25 = int_to_ptr.vmem [resolvable:$true] %s20_s25 }
   0x2   :  { %s1210_s27 = smov 8  }
   0x3   :  { %26 = dma.hbm_to_vmem [thread:$0]  %s19_s23, 49152, %s21_s25, [#allocation3], %s1209_s26, %s1209_s26, %s1210_s27  }
   0x4   :  { %1206 = dma.done.wait [#allocation3], 49152  }
   0x5   :  { %1207 = vsyncadd [#allocation3], 4294918144  ;;  %v102_v0 = vld [vmem:[#allocation2 + $0x78] sm:$0xff]  ;;  %v101_v2 = vld [vmem:[#allocation2 + $0x70] sm:$0xff]  ;;  %vm1080_vm0 = vcmask 523264   ;;  %vm1118_vm1 = vcmask 261120  }
   0x6   :  { %v134_v1 = vld [vmem:[#allocation2 + $0x178] sm:$0xff]  ;;  %473 = vmatpush.msra.mxu0 %v102_v0  ;;  %v133_v4 = vld [vmem:[#allocation2 + $0x170] sm:$0xff]  ;;  %v100_v6 = vld [vmem:[#allocation2 + $0x68] sm:$0xff] }
   0x7   :  { %519 = vmatpush.msra.mxu2 %v134_v1  ;;  %v118_v3 = vld [vmem:[#allocation2 + $0xf8] sm:$0xff]  ;;  %v117_v7 = vld [vmem:[#allocation2 + $0xf0] sm:$0xff]  ;;  %v132_v8 = vld [vmem:[#allocation2 + $0x168] sm:$0xff] }
   0x8   :  { %v150_v5 = vld [vmem:[#allocation2 + $0x1f8] sm:$0xff]  ;;  %496 = vmatpush.msra.mxu1 %v118_v3  ;;  %474 = vmatpush.msra.mxu0 %v101_v2  ;;  %v149_v9 = vld [vmem:[#allocation2 + $0x1f0] sm:$0xff]  ;;  %v116_v10 = vld [vmem:[#allocation2 + $0xe8] sm:$0xff] }
   0x9   :  { %542 = vmatpush.msra.mxu3 %v150_v5  ;;  %520 = vmatpush.msra.mxu2 %v133_v4  ;;  %v99_v11 = vld [vmem:[#allocation2 + $0x60] sm:$0xff]  ;;  %v148_v13 = vld [vmem:[#allocation2 + $0x1e8] sm:$0xff]  ;;  %v98_v16 = vld [vmem:[#allocation2 + $0x58] sm:$0xff] }
   0xa   :  { %497 = vmatpush.msra.mxu1 %v117_v7  ;;  %v131_v12 = vld [vmem:[#allocation2 + $0x160] sm:$0xff]  ;;  %475 = vmatpush.msra.mxu0 %v100_v6  ;;  %v130_v17 = vld [vmem:[#allocation2 + $0x158] sm:$0xff]  ;;  %v97_v20 = vld [vmem:[#allocation2 + $0x50] sm:$0xff] }
   0xb   :  { %543 = vmatpush.msra.mxu3 %v149_v9  ;;  %521 = vmatpush.msra.mxu2 %v132_v8  ;;  %v115_v14 = vld [vmem:[#allocation2 + $0xe0] sm:$0xff]  ;;  %v114_v18 = vld [vmem:[#allocation2 + $0xd8] sm:$0xff]  ;;  %v129_v21 = vld [vmem:[#allocation2 + $0x150] sm:$0xff] }
   0xc   :  { %v147_v15 = vld [vmem:[#allocation2 + $0x1e0] sm:$0xff]  ;;  %498 = vmatpush.msra.mxu1 %v116_v10  ;;  %476 = vmatpush.msra.mxu0 %v99_v11  ;;  %v146_v19 = vld [vmem:[#allocation2 + $0x1d8] sm:$0xff]  ;;  %v113_v22 = vld [vmem:[#allocation2 + $0xd0] sm:$0xff] }
   0xd   :  { %544 = vmatpush.msra.mxu3 %v148_v13  ;;  %522 = vmatpush.msra.mxu2 %v131_v12  ;;  %v145_v23 = vld [vmem:[#allocation2 + $0x1d0] sm:$0xff]  ;;  %v96_v24 = vld [vmem:[#allocation2 + $0x48] sm:$0xff]  ;;  %v95_v28 = vld [vmem:[#allocation2 + $0x40] sm:$0xff] }
   0xe   :  { %499 = vmatpush.msra.mxu1 %v115_v14  ;;  %477 = vmatpush.msra.mxu0 %v98_v16  ;;  %v128_v25 = vld [vmem:[#allocation2 + $0x148] sm:$0xff]  ;;  %v127_v29 = vld [vmem:[#allocation2 + $0x140] sm:$0xff]  ;;  %v94_v32 = vld [vmem:[#allocation2 + $0x38] sm:$0xff] }
   0xf   :  { %545 = vmatpush.msra.mxu3 %v147_v15  ;;  %523 = vmatpush.msra.mxu2 %v130_v17  ;;  %v112_v26 = vld [vmem:[#allocation2 + $0xc8] sm:$0xff]  ;;  %v111_v30 = vld [vmem:[#allocation2 + $0xc0] sm:$0xff]  ;;  %v126_v33 = vld [vmem:[#allocation2 + $0x138] sm:$0xff] }
  0x10   :  { %500 = vmatpush.msra.mxu1 %v114_v18  ;;  %478 = vmatpush.msra.mxu0 %v97_v20  ;;  %v144_v27 = vld [vmem:[#allocation2 + $0x1c8] sm:$0xff]  ;;  %v143_v31 = vld [vmem:[#allocation2 + $0x1c0] sm:$0xff]  ;;  %v110_v34 = vld [vmem:[#allocation2 + $0xb8] sm:$0xff] }
  0x11   :  { %546 = vmatpush.msra.mxu3 %v146_v19  ;;  %524 = vmatpush.msra.mxu2 %v129_v21  ;;  %v142_v35 = vld [vmem:[#allocation2 + $0x1b8] sm:$0xff]  ;;  %v93_v36 = vld [vmem:[#allocation2 + $0x30] sm:$0xff]  ;;  %v92_v40 = vld [vmem:[#allocation2 + $0x28] sm:$0xff] }
  0x12   :  { %501 = vmatpush.msra.mxu1 %v113_v22  ;;  %479 = vmatpush.msra.mxu0 %v96_v24  ;;  %v125_v37 = vld [vmem:[#allocation2 + $0x130] sm:$0xff]  ;;  %v124_v41 = vld [vmem:[#allocation2 + $0x128] sm:$0xff]  ;;  %v91_v44 = vld [vmem:[#allocation2 + $0x20] sm:$0xff] }
  0x13   :  { %547 = vmatpush.msra.mxu3 %v145_v23  ;;  %525 = vmatpush.msra.mxu2 %v128_v25  ;;  %v109_v38 = vld [vmem:[#allocation2 + $0xb0] sm:$0xff]  ;;  %v108_v42 = vld [vmem:[#allocation2 + $0xa8] sm:$0xff]  ;;  %v123_v45 = vld [vmem:[#allocation2 + $0x120] sm:$0xff] }
  0x14   :  { %502 = vmatpush.msra.mxu1 %v112_v26  ;;  %480 = vmatpush.msra.mxu0 %v95_v28  ;;  %v141_v39 = vld [vmem:[#allocation2 + $0x1b0] sm:$0xff]  ;;  %v140_v43 = vld [vmem:[#allocation2 + $0x1a8] sm:$0xff]  ;;  %v107_v46 = vld [vmem:[#allocation2 + $0xa0] sm:$0xff] }
  0x15   :  { %548 = vmatpush.msra.mxu3 %v144_v27  ;;  %526 = vmatpush.msra.mxu2 %v127_v29  ;;  %v139_v47 = vld [vmem:[#allocation2 + $0x1a0] sm:$0xff]  ;;  %v90_v48 = vld [vmem:[#allocation2 + $0x18] sm:$0xff]  ;;  %v89_v52 = vld [vmem:[#allocation2 + $0x10] sm:$0xff] }
  0x16   :  { %503 = vmatpush.msra.mxu1 %v111_v30  ;;  %481 = vmatpush.msra.mxu0 %v94_v32  ;;  %v122_v49 = vld [vmem:[#allocation2 + $0x118] sm:$0xff]  ;;  %v121_v53 = vld [vmem:[#allocation2 + $0x110] sm:$0xff]  ;;  %v88_v56 = vld [vmem:[#allocation2 + $0x8] sm:$0xff] }
  0x17   :  { %549 = vmatpush.msra.mxu3 %v143_v31  ;;  %527 = vmatpush.msra.mxu2 %v126_v33  ;;  %v106_v50 = vld [vmem:[#allocation2 + $0x98] sm:$0xff]  ;;  %v105_v54 = vld [vmem:[#allocation2 + $0x90] sm:$0xff]  ;;  %v120_v57 = vld [vmem:[#allocation2 + $0x108] sm:$0xff] }
  0x18   :  { %504 = vmatpush.msra.mxu1 %v110_v34  ;;  %482 = vmatpush.msra.mxu0 %v93_v36  ;;  %v138_v51 = vld [vmem:[#allocation2 + $0x198] sm:$0xff]  ;;  %v137_v55 = vld [vmem:[#allocation2 + $0x190] sm:$0xff]  ;;  %v104_v58 = vld [vmem:[#allocation2 + $0x88] sm:$0xff] }
  0x19   :  { %550 = vmatpush.msra.mxu3 %v142_v35  ;;  %528 = vmatpush.msra.mxu2 %v125_v37  ;;  %v136_v59 = vld [vmem:[#allocation2 + $0x188] sm:$0xff]  ;;  %v87_v60 = vld [vmem:[#allocation2] sm:$0xff]  ;;  %v166_v62 = vld [vmem:[#allocation2 + $0x278] sm:$0xff] }
  0x1a   :  { %505 = vmatpush.msra.mxu1 %v109_v38  ;;  %483 = vmatpush.msra.mxu0 %v92_v40  ;;  %v119_v61 = vld [vmem:[#allocation2 + $0x100] sm:$0xff]  ;;  %v198_v63 = vld [vmem:[#allocation2 + $0x378] sm:$0xff]  ;;  %v165_v2 = vld [vmem:[#allocation2 + $0x270] sm:$0xff] }
  0x1b   :  { %551 = vmatpush.msra.mxu3 %v141_v39  ;;  %529 = vmatpush.msra.mxu2 %v124_v41  ;;  %v103_v0 = vld [vmem:[#allocation2 + $0x80] sm:$0xff]  ;;  %v182_v3 = vld [vmem:[#allocation2 + $0x2f8] sm:$0xff]  ;;  %v197_v4 = vld [vmem:[#allocation2 + $0x370] sm:$0xff] }
  0x1c   :  { %506 = vmatpush.msra.mxu1 %v108_v42  ;;  %484 = vmatpush.msra.mxu0 %v91_v44  ;;  %v135_v1 = vld [vmem:[#allocation2 + $0x180] sm:$0xff]  ;;  %v214_v5 = vld [vmem:[#allocation2 + $0x3f8] sm:$0xff]  ;;  %v164_v6 = vld [vmem:[#allocation2 + $0x268] sm:$0xff] }
  0x1d   :  { %552 = vmatpush.msra.mxu3 %v140_v43  ;;  %530 = vmatpush.msra.mxu2 %v123_v45  ;;  %v181_v7 = vld [vmem:[#allocation2 + $0x2f0] sm:$0xff]  ;;  %v196_v8 = vld [vmem:[#allocation2 + $0x368] sm:$0xff]  ;;  %v163_v10 = vld [vmem:[#allocation2 + $0x260] sm:$0xff] }
  0x1e   :  { %507 = vmatpush.msra.mxu1 %v107_v46  ;;  %485 = vmatpush.msra.mxu0 %v90_v48  ;;  %v213_v9 = vld [vmem:[#allocation2 + $0x3f0] sm:$0xff]  ;;  %v180_v11 = vld [vmem:[#allocation2 + $0x2e8] sm:$0xff]  ;;  %v195_v12 = vld [vmem:[#allocation2 + $0x360] sm:$0xff] }
  0x1f   :  { %553 = vmatpush.msra.mxu3 %v139_v47  ;;  %531 = vmatpush.msra.mxu2 %v122_v49  ;;  %v212_v13 = vld [vmem:[#allocation2 + $0x3e8] sm:$0xff]  ;;  %v162_v14 = vld [vmem:[#allocation2 + $0x258] sm:$0xff]  ;;  %v179_v15 = vld [vmem:[#allocation2 + $0x2e0] sm:$0xff] }
  0x20   :  { %508 = vmatpush.msra.mxu1 %v106_v50  ;;  %486 = vmatpush.msra.mxu0 %v89_v52  ;;  %v194_v16 = vld [vmem:[#allocation2 + $0x358] sm:$0xff]  ;;  %v211_v17 = vld [vmem:[#allocation2 + $0x3e0] sm:$0xff]  ;;  %v161_v18 = vld [vmem:[#allocation2 + $0x250] sm:$0xff] }
  0x21   :  { %554 = vmatpush.msra.mxu3 %v138_v51  ;;  %532 = vmatpush.msra.mxu2 %v121_v53  ;;  %v178_v19 = vld [vmem:[#allocation2 + $0x2d8] sm:$0xff]  ;;  %v193_v20 = vld [vmem:[#allocation2 + $0x350] sm:$0xff]  ;;  %v160_v22 = vld [vmem:[#allocation2 + $0x248] sm:$0xff] }
  0x22   :  { %509 = vmatpush.msra.mxu1 %v105_v54  ;;  %487 = vmatpush.msra.mxu0 %v88_v56  ;;  %v210_v21 = vld [vmem:[#allocation2 + $0x3d8] sm:$0xff]  ;;  %v177_v23 = vld [vmem:[#allocation2 + $0x2d0] sm:$0xff]  ;;  %v192_v24 = vld [vmem:[#allocation2 + $0x348] sm:$0xff] }
  0x23   :  { %555 = vmatpush.msra.mxu3 %v137_v55  ;;  %533 = vmatpush.msra.mxu2 %v120_v57  ;;  %v209_v25 = vld [vmem:[#allocation2 + $0x3d0] sm:$0xff]  ;;  %v159_v26 = vld [vmem:[#allocation2 + $0x240] sm:$0xff]  ;;  %v176_v27 = vld [vmem:[#allocation2 + $0x2c8] sm:$0xff] }
  0x24   :  { %510 = vmatpush.msra.mxu1 %v104_v58  ;;  %488 = vmatpush.msra.mxu0 %v87_v60  ;;  %v191_v28 = vld [vmem:[#allocation2 + $0x340] sm:$0xff]  ;;  %v208_v29 = vld [vmem:[#allocation2 + $0x3c8] sm:$0xff]  ;;  %v158_v30 = vld [vmem:[#allocation2 + $0x238] sm:$0xff] }
  0x25   :  { %556 = vmatpush.msra.mxu3 %v136_v59  ;;  %534 = vmatpush.msra.mxu2 %v119_v61  ;;  %v175_v31 = vld [vmem:[#allocation2 + $0x2c0] sm:$0xff]  ;;  %v190_v32 = vld [vmem:[#allocation2 + $0x338] sm:$0xff]  ;;  %v157_v34 = vld [vmem:[#allocation2 + $0x230] sm:$0xff] }
  0x26   :  { %565 = vmatpush.msrb.mxu0 %v166_v62  ;;  %511 = vmatpush.msra.mxu1 %v103_v0  ;;  %v207_v33 = vld [vmem:[#allocation2 + $0x3c0] sm:$0xff]  ;;  %v174_v35 = vld [vmem:[#allocation2 + $0x2b8] sm:$0xff]  ;;  %v189_v36 = vld [vmem:[#allocation2 + $0x330] sm:$0xff] }
  0x27   :  { %611 = vmatpush.msrb.mxu2 %v198_v63  ;;  %557 = vmatpush.msra.mxu3 %v135_v1  ;;  %v206_v37 = vld [vmem:[#allocation2 + $0x3b8] sm:$0xff]  ;;  %v156_v38 = vld [vmem:[#allocation2 + $0x228] sm:$0xff]  ;;  %v173_v39 = vld [vmem:[#allocation2 + $0x2b0] sm:$0xff] }
  0x28   :  { %566 = vmatpush.msrb.mxu0 %v165_v2  ;;  %588 = vmatpush.msrb.mxu1 %v182_v3  ;;  %v188_v40 = vld [vmem:[#allocation2 + $0x328] sm:$0xff]  ;;  %v205_v41 = vld [vmem:[#allocation2 + $0x3b0] sm:$0xff]  ;;  %v155_v42 = vld [vmem:[#allocation2 + $0x220] sm:$0xff] }
  0x29   :  { %612 = vmatpush.msrb.mxu2 %v197_v4  ;;  %634 = vmatpush.msrb.mxu3 %v214_v5  ;;  %v172_v43 = vld [vmem:[#allocation2 + $0x2a8] sm:$0xff]  ;;  %v187_v44 = vld [vmem:[#allocation2 + $0x320] sm:$0xff]  ;;  %v41_v46 = vld [vmem:[%s1495_s0 + $0x10] sm:$0xff] }
  0x2a   :  { %567 = vmatpush.msrb.mxu0 %v164_v6  ;;  %589 = vmatpush.msrb.mxu1 %v181_v7  ;;  %v204_v45 = vld [vmem:[#allocation2 + $0x3a8] sm:$0xff]  ;;  %v154_v47 = vld [vmem:[#allocation2 + $0x218] sm:$0xff]  ;;  %v171_v48 = vld [vmem:[#allocation2 + $0x2a0] sm:$0xff] }
  0x2b   :  { %613 = vmatpush.msrb.mxu2 %v196_v8  ;;  %635 = vmatpush.msrb.mxu3 %v213_v9  ;;  %v186_v49 = vld [vmem:[#allocation2 + $0x318] sm:$0xff]  ;;  %v203_v50 = vld [vmem:[#allocation2 + $0x3a0] sm:$0xff]  ;;  %v153_v53 = vld [vmem:[#allocation2 + $0x210] sm:$0xff] }
  0x2c   :  { %568 = vmatpush.msrb.mxu0 %v163_v10  ;;  %590 = vmatpush.msrb.mxu1 %v180_v11  ;;  %v39_v51 = vld [vmem:[%s1495_s0] sm:$0xff]  ;;  %v42_v52 = vld [vmem:[%s1495_s0 + $0x18] sm:$0xff]  ;;  %v185_v55 = vld [vmem:[#allocation2 + $0x310] sm:$0xff] }
  0x2d   :  { %614 = vmatpush.msrb.mxu2 %v195_v12  ;;  %636 = vmatpush.msrb.mxu3 %v212_v13  ;;  %v170_v54 = vld [vmem:[#allocation2 + $0x298] sm:$0xff]  ;;  %v40_v57 = vld [vmem:[%s1495_s0 + $0x8] sm:$0xff]  ;;  %v169_v59 = vld [vmem:[#allocation2 + $0x290] sm:$0xff] }
  0x2e   :  { %569 = vmatpush.msrb.mxu0 %v162_v14  ;;  %591 = vmatpush.msrb.mxu1 %v179_v15  ;;  %v202_v56 = vld [vmem:[#allocation2 + $0x398] sm:$0xff]  ;;  %v152_v58 = vld [vmem:[#allocation2 + $0x208] sm:$0xff]  ;;  %v201_v61 = vld [vmem:[#allocation2 + $0x390] sm:$0xff] }
  0x2f   :  { %615 = vmatpush.msrb.mxu2 %v194_v16  ;;  %637 = vmatpush.msrb.mxu3 %v211_v17  ;;  %v184_v60 = vld [vmem:[#allocation2 + $0x308] sm:$0xff]  ;;  %v151_v62 = vld [vmem:[#allocation2 + $0x200] sm:$0xff]  ;;  %v65_v2 = vld [vmem:[%s1495_s0 + $0xd0] sm:$0xff] }
  0x30   :  { %570 = vmatpush.msrb.mxu0 %v161_v18  ;;  %592 = vmatpush.msrb.mxu1 %v178_v19  ;;  %v168_v63 = vld [vmem:[#allocation2 + $0x288] sm:$0xff]  ;;  %v183_v0 = vld [vmem:[#allocation2 + $0x300] sm:$0xff]  ;;  %v230_v3 = vld [vmem:[#allocation2 + $0x478] sm:$0xff] }
  0x31   :  { %616 = vmatpush.msrb.mxu2 %v193_v20  ;;  %638 = vmatpush.msrb.mxu3 %v210_v21  ;;  %v200_v1 = vld [vmem:[#allocation2 + $0x388] sm:$0xff]  ;;  %v262_v4 = vld [vmem:[#allocation2 + $0x578] sm:$0xff]  ;;  %v167_v5 = vld [vmem:[#allocation2 + $0x280] sm:$0xff] }
  0x32   :  { %571 = vmatpush.msrb.mxu0 %v160_v22  ;;  %593 = vmatpush.msrb.mxu1 %v177_v23  ;;  %v199_v6 = vld [vmem:[#allocation2 + $0x380] sm:$0xff]  ;;  %v66_v8 = vld [vmem:[%s1495_s0 + $0xd8] sm:$0xff]  ;;  %v229_v9 = vld [vmem:[#allocation2 + $0x470] sm:$0xff] }
  0x33   :  { %617 = vmatpush.msrb.mxu2 %v192_v24  ;;  %639 = vmatpush.msrb.mxu3 %v209_v25  ;;  %v63_v7 = vld [vmem:[%s1495_s0 + $0xc0] sm:$0xff]  ;;  %v246_v10 = vld [vmem:[#allocation2 + $0x4f8] sm:$0xff]  ;;  %v261_v11 = vld [vmem:[#allocation2 + $0x570] sm:$0xff] }
  0x34   :  { %572 = vmatpush.msrb.mxu0 %v159_v26  ;;  %594 = vmatpush.msrb.mxu1 %v176_v27  ;;  %v278_v12 = vld [vmem:[#allocation2 + $0x5f8] sm:$0xff]  ;;  %v64_v13 = vld [vmem:[%s1495_s0 + $0xc8] sm:$0xff]  ;;  %v245_v15 = vld [vmem:[#allocation2 + $0x4f0] sm:$0xff] }
  0x35   :  { %618 = vmatpush.msrb.mxu2 %v191_v28  ;;  %640 = vmatpush.msrb.mxu3 %v208_v29  ;;  %v228_v14 = vld [vmem:[#allocation2 + $0x468] sm:$0xff]  ;;  %v277_v17 = vld [vmem:[#allocation2 + $0x5f0] sm:$0xff]  ;;  %v227_v18 = vld [vmem:[#allocation2 + $0x460] sm:$0xff] }
  0x36   :  { %573 = vmatpush.msrb.mxu0 %v158_v30  ;;  %595 = vmatpush.msrb.mxu1 %v175_v31  ;;  %v260_v16 = vld [vmem:[#allocation2 + $0x568] sm:$0xff]  ;;  %v259_v20 = vld [vmem:[#allocation2 + $0x560] sm:$0xff]  ;;  %v45_v22 = vld [vmem:[%s1495_s0 + $0x30] sm:$0xff] }
  0x37   :  { %619 = vmatpush.msrb.mxu2 %v190_v32  ;;  %641 = vmatpush.msrb.mxu3 %v207_v33  ;;  %v244_v19 = vld [vmem:[#allocation2 + $0x4e8] sm:$0xff]  ;;  %v226_v23 = vld [vmem:[#allocation2 + $0x458] sm:$0xff]  ;;  %v243_v24 = vld [vmem:[#allocation2 + $0x4e0] sm:$0xff] }
  0x38   :  { %574 = vmatpush.msrb.mxu0 %v157_v34  ;;  %596 = vmatpush.msrb.mxu1 %v174_v35  ;;  %v276_v21 = vld [vmem:[#allocation2 + $0x5e8] sm:$0xff]  ;;  %v258_v25 = vld [vmem:[#allocation2 + $0x558] sm:$0xff]  ;;  %v275_v26 = vld [vmem:[#allocation2 + $0x5e0] sm:$0xff] }
  0x39   :  { %620 = vmatpush.msrb.mxu2 %v189_v36  ;;  %642 = vmatpush.msrb.mxu3 %v206_v37  ;;  %v43_v27 = vld [vmem:[%s1495_s0 + $0x20] sm:$0xff]  ;;  %v46_v28 = vld [vmem:[%s1495_s0 + $0x38] sm:$0xff]  ;;  %v225_v29 = vld [vmem:[#allocation2 + $0x450] sm:$0xff] }
  0x3a   :  { %575 = vmatpush.msrb.mxu0 %v156_v38  ;;  %597 = vmatpush.msrb.mxu1 %v173_v39  ;;  %v242_v30 = vld [vmem:[#allocation2 + $0x4d8] sm:$0xff]  ;;  %v257_v31 = vld [vmem:[#allocation2 + $0x550] sm:$0xff]  ;;  %v44_v33 = vld [vmem:[%s1495_s0 + $0x28] sm:$0xff] }
  0x3b   :  { %621 = vmatpush.msrb.mxu2 %v188_v40  ;;  %643 = vmatpush.msrb.mxu3 %v205_v41  ;;  %v274_v32 = vld [vmem:[#allocation2 + $0x5d8] sm:$0xff]  ;;  %v224_v34 = vld [vmem:[#allocation2 + $0x448] sm:$0xff]  ;;  %v241_v35 = vld [vmem:[#allocation2 + $0x4d0] sm:$0xff] }
  0x3c   :  { %576 = vmatpush.msrb.mxu0 %v155_v42  ;;  %598 = vmatpush.msrb.mxu1 %v172_v43  ;;  %v256_v36 = vld [vmem:[#allocation2 + $0x548] sm:$0xff]  ;;  %v273_v37 = vld [vmem:[#allocation2 + $0x5d0] sm:$0xff]  ;;  %v223_v38 = vld [vmem:[#allocation2 + $0x440] sm:$0xff] }
  0x3d   :  { %622 = vmatpush.msrb.mxu2 %v187_v44  ;;  %644 = vmatpush.msrb.mxu3 %v204_v45  ;;  %v240_v39 = vld [vmem:[#allocation2 + $0x4c8] sm:$0xff]  ;;  %v255_v40 = vld [vmem:[#allocation2 + $0x540] sm:$0xff]  ;;  %v222_v42 = vld [vmem:[#allocation2 + $0x438] sm:$0xff] }
  0x3e   :  { %535 = vmatmul.f32.vlgmr.msra.gmra.mxu2 %v41_v46  ;;  %577 = vmatpush.msrb.mxu0 %v154_v47  ;;  %v272_v41 = vld [vmem:[#allocation2 + $0x5c8] sm:$0xff]  ;;  %v239_v43 = vld [vmem:[#allocation2 + $0x4c0] sm:$0xff]  ;;  %v254_v44 = vld [vmem:[#allocation2 + $0x538] sm:$0xff] }
  0x3f   :  { %599 = vmatpush.msrb.mxu1 %v171_v48  ;;  %623 = vmatpush.msrb.mxu2 %v186_v49  ;;  %v271_v45 = vld [vmem:[#allocation2 + $0x5c0] sm:$0xff]  ;;  %v221_v46 = vld [vmem:[#allocation2 + $0x430] sm:$0xff]  ;;  %v238_v47 = vld [vmem:[#allocation2 + $0x4b8] sm:$0xff] }
  0x40   :  { %645 = vmatpush.msrb.mxu3 %v203_v50  ;;  %489 = vmatmul.f32.vlgmr.msra.gmra.mxu0 %v39_v51  ;;  %v253_v48 = vld [vmem:[#allocation2 + $0x530] sm:$0xff]  ;;  %v270_v49 = vld [vmem:[#allocation2 + $0x5b8] sm:$0xff]  ;;  %v220_v50 = vld [vmem:[#allocation2 + $0x428] sm:$0xff] }
  0x41   :  { %558 = vmatmul.f32.vlgmr.msra.gmra.mxu3 %v42_v52  ;;  %578 = vmatpush.msrb.mxu0 %v153_v53  ;;  %v237_v51 = vld [vmem:[#allocation2 + $0x4b0] sm:$0xff]  ;;  %v252_v52 = vld [vmem:[#allocation2 + $0x528] sm:$0xff] }
  0x42   :  { %600 = vmatpush.msrb.mxu1 %v170_v54  ;;  %624 = vmatpush.msrb.mxu2 %v185_v55  ;;  %v269_v53 = vld [vmem:[#allocation2 + $0x5b0] sm:$0xff]  ;;  %v219_v54 = vld [vmem:[#allocation2 + $0x420] sm:$0xff]  ;;  %v236_v55 = vld [vmem:[#allocation2 + $0x4a8] sm:$0xff] }
  0x43   :  { %646 = vmatpush.msrb.mxu3 %v202_v56  ;;  %512 = vmatmul.f32.vlgmr.msra.gmra.mxu1 %v40_v57  ;;  %v251_v56 = vld [vmem:[#allocation2 + $0x520] sm:$0xff]  ;;  %v268_v57 = vld [vmem:[#allocation2 + $0x5a8] sm:$0xff] }
  0x44   :  { %579 = vmatpush.msrb.mxu0 %v152_v58  ;;  %601 = vmatpush.msrb.mxu1 %v169_v59  ;;  %v67_v58 = vld [vmem:[%s1495_s0 + $0xe0] sm:$0xff]  ;;  %v69_v59 = vld [vmem:[%s1495_s0 + $0xf0] sm:$0xff] }
  0x45   :  { %625 = vmatpush.msrb.mxu2 %v184_v60  ;;  %647 = vmatpush.msrb.mxu3 %v201_v61  ;;  %v218_v60 = vld [vmem:[#allocation2 + $0x418] sm:$0xff]  ;;  %v235_v61 = vld [vmem:[#allocation2 + $0x4a0] sm:$0xff] }
  0x46   :  { %580 = vmatpush.msrb.mxu0 %v151_v62  ;;  %602 = vmatpush.msrb.mxu1 %v168_v63  ;;  %v250_v62 = vld [vmem:[#allocation2 + $0x518] sm:$0xff]  ;;  %v267_v63 = vld [vmem:[#allocation2 + $0x5a0] sm:$0xff] }
  0x47   :  { %626 = vmatpush.msrb.mxu2 %v183_v0  ;;  %648 = vmatpush.msrb.mxu3 %v200_v1  ;;  %v68_v0 = vld [vmem:[%s1495_s0 + $0xe8] sm:$0xff]  ;;  %v70_v1 = vld [vmem:[%s1495_s0 + $0xf8] sm:$0xff] }
  0x48   :  { %538 = vmatmul.f32.gmra.mxu2 %v65_v2  ;;  %657 = vmatpush.msra.mxu0 %v230_v3  ;;  %v217_v2 = vld [vmem:[#allocation2 + $0x410] sm:$0xff]  ;;  %v234_v3 = vld [vmem:[#allocation2 + $0x498] sm:$0xff] }
  0x49   :  { %703 = vmatpush.msra.mxu2 %v262_v4  ;;  %603 = vmatpush.msrb.mxu1 %v167_v5  ;;  %v249_v4 = vld [vmem:[#allocation2 + $0x510] sm:$0xff]  ;;  %v266_v5 = vld [vmem:[#allocation2 + $0x598] sm:$0xff] }
  0x4a   :  { %649 = vmatpush.msrb.mxu3 %v199_v6  ;;  %492 = vmatmul.f32.gmra.mxu0 %v63_v7  ;;  %v216_v6 = vld [vmem:[#allocation2 + $0x408] sm:$0xff]  ;;  %v233_v7 = vld [vmem:[#allocation2 + $0x490] sm:$0xff] }
  0x4b   :  { %561 = vmatmul.f32.gmra.mxu3 %v66_v8  ;;  %658 = vmatpush.msra.mxu0 %v229_v9  ;;  %v248_v8 = vld [vmem:[#allocation2 + $0x508] sm:$0xff]  ;;  %v265_v9 = vld [vmem:[#allocation2 + $0x590] sm:$0xff] }
  0x4c   :  { %680 = vmatpush.msra.mxu1 %v246_v10  ;;  %704 = vmatpush.msra.mxu2 %v261_v11  ;;  %v215_v10 = vld [vmem:[#allocation2 + $0x400] sm:$0xff]  ;;  %v232_v11 = vld [vmem:[#allocation2 + $0x488] sm:$0xff] }
  0x4d   :  { %726 = vmatpush.msra.mxu3 %v278_v12  ;;  %515 = vmatmul.f32.gmra.mxu1 %v64_v13  ;;  %v247_v12 = vld [vmem:[#allocation2 + $0x500] sm:$0xff]  ;;  %v264_v13 = vld [vmem:[#allocation2 + $0x588] sm:$0xff] }
  0x4e   :  { %659 = vmatpush.msra.mxu0 %v228_v14  ;;  %681 = vmatpush.msra.mxu1 %v245_v15  ;;  %v47_v14 = vld [vmem:[%s1495_s0 + $0x40] sm:$0xff]  ;;  %v49_v15 = vld [vmem:[%s1495_s0 + $0x50] sm:$0xff] }
  0x4f   :  { %705 = vmatpush.msra.mxu2 %v260_v16  ;;  %727 = vmatpush.msra.mxu3 %v277_v17  ;;  %v294_v16 = vld [vmem:[#allocation2 + $0x678] sm:$0xff] }
  0x50   :  { %660 = vmatpush.msra.mxu0 %v227_v18  ;;  %682 = vmatpush.msra.mxu1 %v244_v19  ;;  %v326_v17 = vld [vmem:[#allocation2 + $0x778] sm:$0xff]  ;;  %v231_v18 = vld [vmem:[#allocation2 + $0x480] sm:$0xff] }
  0x51   :  { %706 = vmatpush.msra.mxu2 %v259_v20  ;;  %728 = vmatpush.msra.mxu3 %v276_v21  ;;  %v263_v19 = vld [vmem:[#allocation2 + $0x580] sm:$0xff]  ;;  %v48_v20 = vld [vmem:[%s1495_s0 + $0x48] sm:$0xff]  ;;  %v50_v21 = vld [vmem:[%s1495_s0 + $0x58] sm:$0xff] }
  0x52   :  { %627 = vmatmul.f32.vlgmr.msrb.gmra.mxu2 %v45_v22  ;;  %661 = vmatpush.msra.mxu0 %v226_v23  ;;  %v293_v22 = vld [vmem:[#allocation2 + $0x670] sm:$0xff]  ;;  %v310_v23 = vld [vmem:[#allocation2 + $0x6f8] sm:$0xff] }
  0x53   :  { %683 = vmatpush.msra.mxu1 %v243_v24  ;;  %707 = vmatpush.msra.mxu2 %v258_v25  ;;  %v325_v24 = vld [vmem:[#allocation2 + $0x770] sm:$0xff]  ;;  %v342_v25 = vld [vmem:[#allocation2 + $0x7f8] sm:$0xff] }
  0x54   :  { %729 = vmatpush.msra.mxu3 %v275_v26  ;;  %581 = vmatmul.f32.vlgmr.msrb.gmra.mxu0 %v43_v27  ;;  %v292_v26 = vld [vmem:[#allocation2 + $0x668] sm:$0xff]  ;;  %v309_v27 = vld [vmem:[#allocation2 + $0x6f0] sm:$0xff] }
  0x55   :  { %650 = vmatmul.f32.vlgmr.msrb.gmra.mxu3 %v46_v28  ;;  %662 = vmatpush.msra.mxu0 %v225_v29  ;;  %v324_v28 = vld [vmem:[#allocation2 + $0x768] sm:$0xff]  ;;  %v341_v29 = vld [vmem:[#allocation2 + $0x7f0] sm:$0xff] }
  0x56   :  { %684 = vmatpush.msra.mxu1 %v242_v30  ;;  %708 = vmatpush.msra.mxu2 %v257_v31  ;;  %v291_v30 = vld [vmem:[#allocation2 + $0x660] sm:$0xff]  ;;  %v308_v31 = vld [vmem:[#allocation2 + $0x6e8] sm:$0xff] }
  0x57   :  { %730 = vmatpush.msra.mxu3 %v274_v32  ;;  %604 = vmatmul.f32.vlgmr.msrb.gmra.mxu1 %v44_v33  ;;  %v323_v32 = vld [vmem:[#allocation2 + $0x760] sm:$0xff]  ;;  %v340_v33 = vld [vmem:[#allocation2 + $0x7e8] sm:$0xff] }
  0x58   :  { %663 = vmatpush.msra.mxu0 %v224_v34  ;;  %685 = vmatpush.msra.mxu1 %v241_v35  ;;  %v73_v34 = vld [vmem:[%s1495_s0 + $0x110] sm:$0xff]  ;;  %v290_v35 = vld [vmem:[#allocation2 + $0x658] sm:$0xff] }
  0x59   :  { %709 = vmatpush.msra.mxu2 %v256_v36  ;;  %731 = vmatpush.msra.mxu3 %v273_v37  ;;  %v307_v36 = vld [vmem:[#allocation2 + $0x6e0] sm:$0xff]  ;;  %v322_v37 = vld [vmem:[#allocation2 + $0x758] sm:$0xff] }
  0x5a   :  { %664 = vmatpush.msra.mxu0 %v223_v38  ;;  %686 = vmatpush.msra.mxu1 %v240_v39  ;;  %v339_v38 = vld [vmem:[#allocation2 + $0x7e0] sm:$0xff] }
  0x5b   :  { %710 = vmatpush.msra.mxu2 %v255_v40  ;;  %732 = vmatpush.msra.mxu3 %v272_v41  ;;  %v71_v39 = vld [vmem:[%s1495_s0 + $0x100] sm:$0xff]  ;;  %v74_v40 = vld [vmem:[%s1495_s0 + $0x118] sm:$0xff]  ;;  %v289_v41 = vld [vmem:[#allocation2 + $0x650] sm:$0xff] }
  0x5c   :  { %665 = vmatpush.msra.mxu0 %v222_v42  ;;  %687 = vmatpush.msra.mxu1 %v239_v43  ;;  %v306_v42 = vld [vmem:[#allocation2 + $0x6d8] sm:$0xff]  ;;  %v321_v43 = vld [vmem:[#allocation2 + $0x750] sm:$0xff] }
  0x5d   :  { %711 = vmatpush.msra.mxu2 %v254_v44  ;;  %733 = vmatpush.msra.mxu3 %v271_v45  ;;  %v338_v44 = vld [vmem:[#allocation2 + $0x7d8] sm:$0xff]  ;;  %v72_v45 = vld [vmem:[%s1495_s0 + $0x108] sm:$0xff] }
  0x5e   :  { %666 = vmatpush.msra.mxu0 %v221_v46  ;;  %688 = vmatpush.msra.mxu1 %v238_v47  ;;  %v288_v46 = vld [vmem:[#allocation2 + $0x648] sm:$0xff]  ;;  %v305_v47 = vld [vmem:[#allocation2 + $0x6d0] sm:$0xff] }
  0x5f   :  { %712 = vmatpush.msra.mxu2 %v253_v48  ;;  %734 = vmatpush.msra.mxu3 %v270_v49  ;;  %v320_v48 = vld [vmem:[#allocation2 + $0x748] sm:$0xff]  ;;  %v337_v49 = vld [vmem:[#allocation2 + $0x7d0] sm:$0xff] }
  0x60   :  { %667 = vmatpush.msra.mxu0 %v220_v50  ;;  %689 = vmatpush.msra.mxu1 %v237_v51  ;;  %v287_v50 = vld [vmem:[#allocation2 + $0x640] sm:$0xff]  ;;  %v304_v51 = vld [vmem:[#allocation2 + $0x6c8] sm:$0xff] }
  0x61   :  { %713 = vmatpush.msra.mxu2 %v252_v52  ;;  %735 = vmatpush.msra.mxu3 %v269_v53  ;;  %v319_v52 = vld [vmem:[#allocation2 + $0x740] sm:$0xff]  ;;  %v336_v53 = vld [vmem:[#allocation2 + $0x7c8] sm:$0xff] }
  0x62   :  { %668 = vmatpush.msra.mxu0 %v219_v54  ;;  %690 = vmatpush.msra.mxu1 %v236_v55  ;;  %v286_v54 = vld [vmem:[#allocation2 + $0x638] sm:$0xff]  ;;  %v303_v55 = vld [vmem:[#allocation2 + $0x6c0] sm:$0xff] }
  0x63   :  { %714 = vmatpush.msra.mxu2 %v251_v56  ;;  %736 = vmatpush.msra.mxu3 %v268_v57  ;;  %v318_v56 = vld [vmem:[#allocation2 + $0x738] sm:$0xff]  ;;  %v335_v57 = vld [vmem:[#allocation2 + $0x7c0] sm:$0xff] }
  0x64   :  { %584 = vmatmul.f32.gmra.mxu0 %v67_v58  ;;  %630 = vmatmul.f32.gmra.mxu2 %v69_v59  ;;  %v285_v58 = vld [vmem:[#allocation2 + $0x630] sm:$0xff]  ;;  %v302_v59 = vld [vmem:[#allocation2 + $0x6b8] sm:$0xff] }
  0x65   :  { %669 = vmatpush.msra.mxu0 %v218_v60  ;;  %691 = vmatpush.msra.mxu1 %v235_v61  ;;  %v317_v60 = vld [vmem:[#allocation2 + $0x730] sm:$0xff]  ;;  %v334_v61 = vld [vmem:[#allocation2 + $0x7b8] sm:$0xff] }
  0x66   :  { %715 = vmatpush.msra.mxu2 %v250_v62  ;;  %737 = vmatpush.msra.mxu3 %v267_v63  ;;  %v284_v62 = vld [vmem:[#allocation2 + $0x628] sm:$0xff]  ;;  %v301_v63 = vld [vmem:[#allocation2 + $0x6b0] sm:$0xff] }
  0x67   :  { %607 = vmatmul.f32.gmra.mxu1 %v68_v0  ;;  %653 = vmatmul.f32.gmra.mxu3 %v70_v1  ;;  %v316_v0 = vld [vmem:[#allocation2 + $0x728] sm:$0xff]  ;;  %v333_v1 = vld [vmem:[#allocation2 + $0x7b0] sm:$0xff] }
  0x68   :  { %670 = vmatpush.msra.mxu0 %v217_v2  ;;  %692 = vmatpush.msra.mxu1 %v234_v3  ;;  %v283_v2 = vld [vmem:[#allocation2 + $0x620] sm:$0xff]  ;;  %v300_v3 = vld [vmem:[#allocation2 + $0x6a8] sm:$0xff] }
  0x69   :  { %716 = vmatpush.msra.mxu2 %v249_v4  ;;  %738 = vmatpush.msra.mxu3 %v266_v5  ;;  %v315_v4 = vld [vmem:[#allocation2 + $0x720] sm:$0xff]  ;;  %v332_v5 = vld [vmem:[#allocation2 + $0x7a8] sm:$0xff] }
  0x6a   :  { %671 = vmatpush.msra.mxu0 %v216_v6  ;;  %693 = vmatpush.msra.mxu1 %v233_v7  ;;  %v282_v6 = vld [vmem:[#allocation2 + $0x618] sm:$0xff]  ;;  %v299_v7 = vld [vmem:[#allocation2 + $0x6a0] sm:$0xff] }
  0x6b   :  { %717 = vmatpush.msra.mxu2 %v248_v8  ;;  %739 = vmatpush.msra.mxu3 %v265_v9  ;;  %v314_v8 = vld [vmem:[#allocation2 + $0x718] sm:$0xff]  ;;  %v331_v9 = vld [vmem:[#allocation2 + $0x7a0] sm:$0xff] }
  0x6c   :  { %672 = vmatpush.msra.mxu0 %v215_v10  ;;  %694 = vmatpush.msra.mxu1 %v232_v11  ;;  %v281_v10 = vld [vmem:[#allocation2 + $0x610] sm:$0xff]  ;;  %v298_v11 = vld [vmem:[#allocation2 + $0x698] sm:$0xff] }
  0x6d   :  { %718 = vmatpush.msra.mxu2 %v247_v12  ;;  %740 = vmatpush.msra.mxu3 %v264_v13  ;;  %v313_v12 = vld [vmem:[#allocation2 + $0x710] sm:$0xff]  ;;  %v330_v13 = vld [vmem:[#allocation2 + $0x798] sm:$0xff] }
  0x6e   :  { %673 = vmatmul.f32.vlgmr.msra.gmra.mxu0 %v47_v14  ;;  %719 = vmatmul.f32.vlgmr.msra.gmra.mxu2 %v49_v15  ;;  %v280_v14 = vld [vmem:[#allocation2 + $0x608] sm:$0xff]  ;;  %v297_v15 = vld [vmem:[#allocation2 + $0x690] sm:$0xff] }
  0x6f   :  { %749 = vmatpush.msrb.mxu0 %v294_v16  ;;  %795 = vmatpush.msrb.mxu2 %v326_v17  ;;  %v312_v16 = vld [vmem:[#allocation2 + $0x708] sm:$0xff]  ;;  %v329_v17 = vld [vmem:[#allocation2 + $0x790] sm:$0xff] }
  0x70   :  { %695 = vmatpush.msra.mxu1 %v231_v18  ;;  %741 = vmatpush.msra.mxu3 %v263_v19  ;;  %v279_v18 = vld [vmem:[#allocation2 + $0x600] sm:$0xff]  ;;  %v296_v19 = vld [vmem:[#allocation2 + $0x688] sm:$0xff] }
  0x71   :  { %696 = vmatmul.f32.vlgmr.msra.gmra.mxu1 %v48_v20  ;;  %742 = vmatmul.f32.vlgmr.msra.gmra.mxu3 %v50_v21  ;;  %v311_v20 = vld [vmem:[#allocation2 + $0x700] sm:$0xff]  ;;  %v328_v21 = vld [vmem:[#allocation2 + $0x788] sm:$0xff] }
  0x72   :  { %750 = vmatpush.msrb.mxu0 %v293_v22  ;;  %772 = vmatpush.msrb.mxu1 %v310_v23  ;;  %v51_v22 = vld [vmem:[%s1495_s0 + $0x60] sm:$0xff]  ;;  %v53_v23 = vld [vmem:[%s1495_s0 + $0x70] sm:$0xff] }
  0x73   :  { %796 = vmatpush.msrb.mxu2 %v325_v24  ;;  %818 = vmatpush.msrb.mxu3 %v342_v25  ;;  %v358_v24 = vld [vmem:[#allocation2 + $0x878] sm:$0xff] }
  0x74   :  { %751 = vmatpush.msrb.mxu0 %v292_v26  ;;  %773 = vmatpush.msrb.mxu1 %v309_v27  ;;  %v390_v25 = vld [vmem:[#allocation2 + $0x978] sm:$0xff]  ;;  %v295_v26 = vld [vmem:[#allocation2 + $0x680] sm:$0xff] }
  0x75   :  { %797 = vmatpush.msrb.mxu2 %v324_v28  ;;  %819 = vmatpush.msrb.mxu3 %v341_v29  ;;  %v327_v27 = vld [vmem:[#allocation2 + $0x780] sm:$0xff]  ;;  %v52_v28 = vld [vmem:[%s1495_s0 + $0x68] sm:$0xff]  ;;  %v54_v29 = vld [vmem:[%s1495_s0 + $0x78] sm:$0xff] }
  0x76   :  { %752 = vmatpush.msrb.mxu0 %v291_v30  ;;  %774 = vmatpush.msrb.mxu1 %v308_v31  ;;  %v357_v30 = vld [vmem:[#allocation2 + $0x870] sm:$0xff]  ;;  %v374_v31 = vld [vmem:[#allocation2 + $0x8f8] sm:$0xff] }
  0x77   :  { %798 = vmatpush.msrb.mxu2 %v323_v32  ;;  %820 = vmatpush.msrb.mxu3 %v340_v33  ;;  %v389_v32 = vld [vmem:[#allocation2 + $0x970] sm:$0xff]  ;;  %v406_v33 = vld [vmem:[#allocation2 + $0x9f8] sm:$0xff] }
  0x78   :  { %722 = vmatmul.f32.gmra.mxu2 %v73_v34  ;;  %753 = vmatpush.msrb.mxu0 %v290_v35  ;;  %v356_v34 = vld [vmem:[#allocation2 + $0x868] sm:$0xff]  ;;  %v373_v35 = vld [vmem:[#allocation2 + $0x8f0] sm:$0xff] }
  0x79   :  { %775 = vmatpush.msrb.mxu1 %v307_v36  ;;  %799 = vmatpush.msrb.mxu2 %v322_v37  ;;  %v388_v36 = vld [vmem:[#allocation2 + $0x968] sm:$0xff]  ;;  %v405_v37 = vld [vmem:[#allocation2 + $0x9f0] sm:$0xff] }
  0x7a   :  { %821 = vmatpush.msrb.mxu3 %v339_v38  ;;  %676 = vmatmul.f32.gmra.mxu0 %v71_v39  ;;  %v355_v38 = vld [vmem:[#allocation2 + $0x860] sm:$0xff]  ;;  %v372_v39 = vld [vmem:[#allocation2 + $0x8e8] sm:$0xff] }
  0x7b   :  { %745 = vmatmul.f32.gmra.mxu3 %v74_v40  ;;  %754 = vmatpush.msrb.mxu0 %v289_v41  ;;  %v387_v40 = vld [vmem:[#allocation2 + $0x960] sm:$0xff]  ;;  %v404_v41 = vld [vmem:[#allocation2 + $0x9e8] sm:$0xff] }
  0x7c   :  { %776 = vmatpush.msrb.mxu1 %v306_v42  ;;  %800 = vmatpush.msrb.mxu2 %v321_v43  ;;  %v75_v42 = vld [vmem:[%s1495_s0 + $0x120] sm:$0xff]  ;;  %v77_v43 = vld [vmem:[%s1495_s0 + $0x130] sm:$0xff] }
  0x7d   :  { %822 = vmatpush.msrb.mxu3 %v338_v44  ;;  %699 = vmatmul.f32.gmra.mxu1 %v72_v45  ;;  %v354_v44 = vld [vmem:[#allocation2 + $0x858] sm:$0xff]  ;;  %v371_v45 = vld [vmem:[#allocation2 + $0x8e0] sm:$0xff] }
  0x7e   :  { %755 = vmatpush.msrb.mxu0 %v288_v46  ;;  %777 = vmatpush.msrb.mxu1 %v305_v47  ;;  %v386_v46 = vld [vmem:[#allocation2 + $0x958] sm:$0xff]  ;;  %v403_v47 = vld [vmem:[#allocation2 + $0x9e0] sm:$0xff] }
  0x7f   :  { %801 = vmatpush.msrb.mxu2 %v320_v48  ;;  %823 = vmatpush.msrb.mxu3 %v337_v49  ;;  %v76_v48 = vld [vmem:[%s1495_s0 + $0x128] sm:$0xff]  ;;  %v78_v49 = vld [vmem:[%s1495_s0 + $0x138] sm:$0xff] }
  0x80   :  { %756 = vmatpush.msrb.mxu0 %v287_v50  ;;  %778 = vmatpush.msrb.mxu1 %v304_v51  ;;  %v353_v50 = vld [vmem:[#allocation2 + $0x850] sm:$0xff]  ;;  %v370_v51 = vld [vmem:[#allocation2 + $0x8d8] sm:$0xff] }
  0x81   :  { %802 = vmatpush.msrb.mxu2 %v319_v52  ;;  %824 = vmatpush.msrb.mxu3 %v336_v53  ;;  %v385_v52 = vld [vmem:[#allocation2 + $0x950] sm:$0xff]  ;;  %v402_v53 = vld [vmem:[#allocation2 + $0x9d8] sm:$0xff] }
  0x82   :  { %757 = vmatpush.msrb.mxu0 %v286_v54  ;;  %779 = vmatpush.msrb.mxu1 %v303_v55  ;;  %v352_v54 = vld [vmem:[#allocation2 + $0x848] sm:$0xff]  ;;  %v369_v55 = vld [vmem:[#allocation2 + $0x8d0] sm:$0xff] }
  0x83   :  { %803 = vmatpush.msrb.mxu2 %v318_v56  ;;  %825 = vmatpush.msrb.mxu3 %v335_v57  ;;  %v384_v56 = vld [vmem:[#allocation2 + $0x948] sm:$0xff]  ;;  %v401_v57 = vld [vmem:[#allocation2 + $0x9d0] sm:$0xff] }
  0x84   :  { %758 = vmatpush.msrb.mxu0 %v285_v58  ;;  %780 = vmatpush.msrb.mxu1 %v302_v59  ;;  %v351_v58 = vld [vmem:[#allocation2 + $0x840] sm:$0xff]  ;;  %v368_v59 = vld [vmem:[#allocation2 + $0x8c8] sm:$0xff] }
  0x85   :  { %804 = vmatpush.msrb.mxu2 %v317_v60  ;;  %826 = vmatpush.msrb.mxu3 %v334_v61  ;;  %v383_v60 = vld [vmem:[#allocation2 + $0x940] sm:$0xff]  ;;  %v400_v61 = vld [vmem:[#allocation2 + $0x9c8] sm:$0xff] }
  0x86   :  { %759 = vmatpush.msrb.mxu0 %v284_v62  ;;  %781 = vmatpush.msrb.mxu1 %v301_v63  ;;  %v350_v62 = vld [vmem:[#allocation2 + $0x838] sm:$0xff]  ;;  %v367_v63 = vld [vmem:[#allocation2 + $0x8c0] sm:$0xff] }
  0x87   :  { %805 = vmatpush.msrb.mxu2 %v316_v0  ;;  %827 = vmatpush.msrb.mxu3 %v333_v1  ;;  %v382_v0 = vld [vmem:[#allocation2 + $0x938] sm:$0xff]  ;;  %v399_v1 = vld [vmem:[#allocation2 + $0x9c0] sm:$0xff] }
  0x88   :  { %760 = vmatpush.msrb.mxu0 %v283_v2  ;;  %782 = vmatpush.msrb.mxu1 %v300_v3  ;;  %v349_v2 = vld [vmem:[#allocation2 + $0x830] sm:$0xff]  ;;  %v366_v3 = vld [vmem:[#allocation2 + $0x8b8] sm:$0xff] }
  0x89   :  { %806 = vmatpush.msrb.mxu2 %v315_v4  ;;  %828 = vmatpush.msrb.mxu3 %v332_v5  ;;  %v381_v4 = vld [vmem:[#allocation2 + $0x930] sm:$0xff]  ;;  %v398_v5 = vld [vmem:[#allocation2 + $0x9b8] sm:$0xff] }
  0x8a   :  { %761 = vmatpush.msrb.mxu0 %v282_v6  ;;  %783 = vmatpush.msrb.mxu1 %v299_v7  ;;  %v348_v6 = vld [vmem:[#allocation2 + $0x828] sm:$0xff]  ;;  %v365_v7 = vld [vmem:[#allocation2 + $0x8b0] sm:$0xff] }
  0x8b   :  { %807 = vmatpush.msrb.mxu2 %v314_v8  ;;  %829 = vmatpush.msrb.mxu3 %v331_v9  ;;  %v380_v8 = vld [vmem:[#allocation2 + $0x928] sm:$0xff]  ;;  %v397_v9 = vld [vmem:[#allocation2 + $0x9b0] sm:$0xff] }
  0x8c   :  { %762 = vmatpush.msrb.mxu0 %v281_v10  ;;  %784 = vmatpush.msrb.mxu1 %v298_v11  ;;  %v347_v10 = vld [vmem:[#allocation2 + $0x820] sm:$0xff]  ;;  %v364_v11 = vld [vmem:[#allocation2 + $0x8a8] sm:$0xff] }
  0x8d   :  { %808 = vmatpush.msrb.mxu2 %v313_v12  ;;  %830 = vmatpush.msrb.mxu3 %v330_v13  ;;  %v379_v12 = vld [vmem:[#allocation2 + $0x920] sm:$0xff]  ;;  %v396_v13 = vld [vmem:[#allocation2 + $0x9a8] sm:$0xff] }
  0x8e   :  { %763 = vmatpush.msrb.mxu0 %v280_v14  ;;  %785 = vmatpush.msrb.mxu1 %v297_v15  ;;  %v346_v14 = vld [vmem:[#allocation2 + $0x818] sm:$0xff]  ;;  %v363_v15 = vld [vmem:[#allocation2 + $0x8a0] sm:$0xff] }
  0x8f   :  { %809 = vmatpush.msrb.mxu2 %v312_v16  ;;  %831 = vmatpush.msrb.mxu3 %v329_v17  ;;  %v378_v16 = vld [vmem:[#allocation2 + $0x918] sm:$0xff]  ;;  %v395_v17 = vld [vmem:[#allocation2 + $0x9a0] sm:$0xff] }
  0x90   :  { %764 = vmatpush.msrb.mxu0 %v279_v18  ;;  %786 = vmatpush.msrb.mxu1 %v296_v19  ;;  %v345_v18 = vld [vmem:[#allocation2 + $0x810] sm:$0xff]  ;;  %v362_v19 = vld [vmem:[#allocation2 + $0x898] sm:$0xff] }
  0x91   :  { %810 = vmatpush.msrb.mxu2 %v311_v20  ;;  %832 = vmatpush.msrb.mxu3 %v328_v21  ;;  %v377_v20 = vld [vmem:[#allocation2 + $0x910] sm:$0xff]  ;;  %v394_v21 = vld [vmem:[#allocation2 + $0x998] sm:$0xff] }
  0x92   :  { %765 = vmatmul.f32.vlgmr.msrb.gmra.mxu0 %v51_v22  ;;  %811 = vmatmul.f32.vlgmr.msrb.gmra.mxu2 %v53_v23  ;;  %v344_v22 = vld [vmem:[#allocation2 + $0x808] sm:$0xff]  ;;  %v361_v23 = vld [vmem:[#allocation2 + $0x890] sm:$0xff] }
  0x93   :  { %841 = vmatpush.msra.mxu0 %v358_v24  ;;  %887 = vmatpush.msra.mxu2 %v390_v25  ;;  %v376_v24 = vld [vmem:[#allocation2 + $0x908] sm:$0xff]  ;;  %v393_v25 = vld [vmem:[#allocation2 + $0x990] sm:$0xff] }
  0x94   :  { %787 = vmatpush.msrb.mxu1 %v295_v26  ;;  %833 = vmatpush.msrb.mxu3 %v327_v27  ;;  %v343_v26 = vld [vmem:[#allocation2 + $0x800] sm:$0xff]  ;;  %v360_v27 = vld [vmem:[#allocation2 + $0x888] sm:$0xff] }
  0x95   :  { %788 = vmatmul.f32.vlgmr.msrb.gmra.mxu1 %v52_v28  ;;  %834 = vmatmul.f32.vlgmr.msrb.gmra.mxu3 %v54_v29  ;;  %v375_v28 = vld [vmem:[#allocation2 + $0x900] sm:$0xff]  ;;  %v392_v29 = vld [vmem:[#allocation2 + $0x988] sm:$0xff] }
  0x96   :  { %842 = vmatpush.msra.mxu0 %v357_v30  ;;  %864 = vmatpush.msra.mxu1 %v374_v31  ;;  %v55_v30 = vld [vmem:[%s1495_s0 + $0x80] sm:$0xff]  ;;  %v57_v31 = vld [vmem:[%s1495_s0 + $0x90] sm:$0xff] }
  0x97   :  { %888 = vmatpush.msra.mxu2 %v389_v32  ;;  %910 = vmatpush.msra.mxu3 %v406_v33  ;;  %v422_v32 = vld [vmem:[#allocation2 + $0xa78] sm:$0xff] }
  0x98   :  { %843 = vmatpush.msra.mxu0 %v356_v34  ;;  %865 = vmatpush.msra.mxu1 %v373_v35  ;;  %v454_v33 = vld [vmem:[#allocation2 + $0xb78] sm:$0xff]  ;;  %v359_v34 = vld [vmem:[#allocation2 + $0x880] sm:$0xff] }
  0x99   :  { %889 = vmatpush.msra.mxu2 %v388_v36  ;;  %911 = vmatpush.msra.mxu3 %v405_v37  ;;  %v391_v35 = vld [vmem:[#allocation2 + $0x980] sm:$0xff]  ;;  %v56_v36 = vld [vmem:[%s1495_s0 + $0x88] sm:$0xff]  ;;  %v58_v37 = vld [vmem:[%s1495_s0 + $0x98] sm:$0xff] }
  0x9a   :  { %844 = vmatpush.msra.mxu0 %v355_v38  ;;  %866 = vmatpush.msra.mxu1 %v372_v39  ;;  %v421_v38 = vld [vmem:[#allocation2 + $0xa70] sm:$0xff]  ;;  %v438_v39 = vld [vmem:[#allocation2 + $0xaf8] sm:$0xff] }
  0x9b   :  { %890 = vmatpush.msra.mxu2 %v387_v40  ;;  %912 = vmatpush.msra.mxu3 %v404_v41  ;;  %v453_v40 = vld [vmem:[#allocation2 + $0xb70] sm:$0xff]  ;;  %v470_v41 = vld [vmem:[#allocation2 + $0xbf8] sm:$0xff] }
  0x9c   :  { %768 = vmatmul.f32.gmra.mxu0 %v75_v42  ;;  %814 = vmatmul.f32.gmra.mxu2 %v77_v43  ;;  %v420_v42 = vld [vmem:[#allocation2 + $0xa68] sm:$0xff]  ;;  %v437_v43 = vld [vmem:[#allocation2 + $0xaf0] sm:$0xff] }
  0x9d   :  { %845 = vmatpush.msra.mxu0 %v354_v44  ;;  %867 = vmatpush.msra.mxu1 %v371_v45  ;;  %v452_v44 = vld [vmem:[#allocation2 + $0xb68] sm:$0xff]  ;;  %v469_v45 = vld [vmem:[#allocation2 + $0xbf0] sm:$0xff] }
  0x9e   :  { %891 = vmatpush.msra.mxu2 %v386_v46  ;;  %913 = vmatpush.msra.mxu3 %v403_v47  ;;  %v419_v46 = vld [vmem:[#allocation2 + $0xa60] sm:$0xff]  ;;  %v436_v47 = vld [vmem:[#allocation2 + $0xae8] sm:$0xff] }
  0x9f   :  { %791 = vmatmul.f32.gmra.mxu1 %v76_v48  ;;  %837 = vmatmul.f32.gmra.mxu3 %v78_v49  ;;  %v451_v48 = vld [vmem:[#allocation2 + $0xb60] sm:$0xff]  ;;  %v468_v49 = vld [vmem:[#allocation2 + $0xbe8] sm:$0xff] }
  0xa0   :  { %846 = vmatpush.msra.mxu0 %v353_v50  ;;  %868 = vmatpush.msra.mxu1 %v370_v51  ;;  %v79_v50 = vld [vmem:[%s1495_s0 + $0x140] sm:$0xff]  ;;  %v81_v51 = vld [vmem:[%s1495_s0 + $0x150] sm:$0xff] }
  0xa1   :  { %892 = vmatpush.msra.mxu2 %v385_v52  ;;  %914 = vmatpush.msra.mxu3 %v402_v53  ;;  %v418_v52 = vld [vmem:[#allocation2 + $0xa58] sm:$0xff]  ;;  %v435_v53 = vld [vmem:[#allocation2 + $0xae0] sm:$0xff] }
  0xa2   :  { %847 = vmatpush.msra.mxu0 %v352_v54  ;;  %869 = vmatpush.msra.mxu1 %v369_v55  ;;  %v450_v54 = vld [vmem:[#allocation2 + $0xb58] sm:$0xff]  ;;  %v467_v55 = vld [vmem:[#allocation2 + $0xbe0] sm:$0xff] }
  0xa3   :  { %893 = vmatpush.msra.mxu2 %v384_v56  ;;  %915 = vmatpush.msra.mxu3 %v401_v57  ;;  %v80_v56 = vld [vmem:[%s1495_s0 + $0x148] sm:$0xff]  ;;  %v82_v57 = vld [vmem:[%s1495_s0 + $0x158] sm:$0xff] }
  0xa4   :  { %848 = vmatpush.msra.mxu0 %v351_v58  ;;  %870 = vmatpush.msra.mxu1 %v368_v59  ;;  %v417_v58 = vld [vmem:[#allocation2 + $0xa50] sm:$0xff]  ;;  %v434_v59 = vld [vmem:[#allocation2 + $0xad8] sm:$0xff] }
  0xa5   :  { %894 = vmatpush.msra.mxu2 %v383_v60  ;;  %916 = vmatpush.msra.mxu3 %v400_v61  ;;  %v449_v60 = vld [vmem:[#allocation2 + $0xb50] sm:$0xff]  ;;  %v466_v61 = vld [vmem:[#allocation2 + $0xbd8] sm:$0xff] }
  0xa6   :  { %849 = vmatpush.msra.mxu0 %v350_v62  ;;  %871 = vmatpush.msra.mxu1 %v367_v63  ;;  %v416_v62 = vld [vmem:[#allocation2 + $0xa48] sm:$0xff]  ;;  %v433_v63 = vld [vmem:[#allocation2 + $0xad0] sm:$0xff] }
  0xa7   :  { %895 = vmatpush.msra.mxu2 %v382_v0  ;;  %917 = vmatpush.msra.mxu3 %v399_v1  ;;  %v448_v0 = vld [vmem:[#allocation2 + $0xb48] sm:$0xff]  ;;  %v465_v1 = vld [vmem:[#allocation2 + $0xbd0] sm:$0xff] }
  0xa8   :  { %850 = vmatpush.msra.mxu0 %v349_v2  ;;  %872 = vmatpush.msra.mxu1 %v366_v3  ;;  %v415_v2 = vld [vmem:[#allocation2 + $0xa40] sm:$0xff]  ;;  %v432_v3 = vld [vmem:[#allocation2 + $0xac8] sm:$0xff] }
  0xa9   :  { %896 = vmatpush.msra.mxu2 %v381_v4  ;;  %918 = vmatpush.msra.mxu3 %v398_v5  ;;  %v447_v4 = vld [vmem:[#allocation2 + $0xb40] sm:$0xff]  ;;  %v464_v5 = vld [vmem:[#allocation2 + $0xbc8] sm:$0xff] }
  0xaa   :  { %851 = vmatpush.msra.mxu0 %v348_v6  ;;  %873 = vmatpush.msra.mxu1 %v365_v7  ;;  %v414_v6 = vld [vmem:[#allocation2 + $0xa38] sm:$0xff]  ;;  %v431_v7 = vld [vmem:[#allocation2 + $0xac0] sm:$0xff] }
  0xab   :  { %897 = vmatpush.msra.mxu2 %v380_v8  ;;  %919 = vmatpush.msra.mxu3 %v397_v9  ;;  %v446_v8 = vld [vmem:[#allocation2 + $0xb38] sm:$0xff]  ;;  %v463_v9 = vld [vmem:[#allocation2 + $0xbc0] sm:$0xff] }
  0xac   :  { %852 = vmatpush.msra.mxu0 %v347_v10  ;;  %874 = vmatpush.msra.mxu1 %v364_v11  ;;  %v413_v10 = vld [vmem:[#allocation2 + $0xa30] sm:$0xff]  ;;  %v430_v11 = vld [vmem:[#allocation2 + $0xab8] sm:$0xff] }
  0xad   :  { %898 = vmatpush.msra.mxu2 %v379_v12  ;;  %920 = vmatpush.msra.mxu3 %v396_v13  ;;  %v445_v12 = vld [vmem:[#allocation2 + $0xb30] sm:$0xff]  ;;  %v462_v13 = vld [vmem:[#allocation2 + $0xbb8] sm:$0xff] }
  0xae   :  { %853 = vmatpush.msra.mxu0 %v346_v14  ;;  %875 = vmatpush.msra.mxu1 %v363_v15  ;;  %v412_v14 = vld [vmem:[#allocation2 + $0xa28] sm:$0xff]  ;;  %v429_v15 = vld [vmem:[#allocation2 + $0xab0] sm:$0xff] }
  0xaf   :  { %899 = vmatpush.msra.mxu2 %v378_v16  ;;  %921 = vmatpush.msra.mxu3 %v395_v17  ;;  %v444_v16 = vld [vmem:[#allocation2 + $0xb28] sm:$0xff]  ;;  %v461_v17 = vld [vmem:[#allocation2 + $0xbb0] sm:$0xff] }
  0xb0   :  { %854 = vmatpush.msra.mxu0 %v345_v18  ;;  %876 = vmatpush.msra.mxu1 %v362_v19  ;;  %v411_v18 = vld [vmem:[#allocation2 + $0xa20] sm:$0xff]  ;;  %v428_v19 = vld [vmem:[#allocation2 + $0xaa8] sm:$0xff] }
  0xb1   :  { %900 = vmatpush.msra.mxu2 %v377_v20  ;;  %922 = vmatpush.msra.mxu3 %v394_v21  ;;  %v443_v20 = vld [vmem:[#allocation2 + $0xb20] sm:$0xff]  ;;  %v460_v21 = vld [vmem:[#allocation2 + $0xba8] sm:$0xff] }
  0xb2   :  { %855 = vmatpush.msra.mxu0 %v344_v22  ;;  %877 = vmatpush.msra.mxu1 %v361_v23  ;;  %v410_v22 = vld [vmem:[#allocation2 + $0xa18] sm:$0xff]  ;;  %v427_v23 = vld [vmem:[#allocation2 + $0xaa0] sm:$0xff] }
  0xb3   :  { %901 = vmatpush.msra.mxu2 %v376_v24  ;;  %923 = vmatpush.msra.mxu3 %v393_v25  ;;  %v442_v24 = vld [vmem:[#allocation2 + $0xb18] sm:$0xff]  ;;  %v459_v25 = vld [vmem:[#allocation2 + $0xba0] sm:$0xff] }
  0xb4   :  { %856 = vmatpush.msra.mxu0 %v343_v26  ;;  %878 = vmatpush.msra.mxu1 %v360_v27  ;;  %v409_v26 = vld [vmem:[#allocation2 + $0xa10] sm:$0xff]  ;;  %v426_v27 = vld [vmem:[#allocation2 + $0xa98] sm:$0xff] }
  0xb5   :  { %902 = vmatpush.msra.mxu2 %v375_v28  ;;  %924 = vmatpush.msra.mxu3 %v392_v29  ;;  %v441_v28 = vld [vmem:[#allocation2 + $0xb10] sm:$0xff]  ;;  %v458_v29 = vld [vmem:[#allocation2 + $0xb98] sm:$0xff] }
  0xb6   :  { %857 = vmatmul.f32.vlgmr.msra.gmra.mxu0 %v55_v30  ;;  %903 = vmatmul.f32.vlgmr.msra.gmra.mxu2 %v57_v31  ;;  %v408_v30 = vld [vmem:[#allocation2 + $0xa08] sm:$0xff]  ;;  %v425_v31 = vld [vmem:[#allocation2 + $0xa90] sm:$0xff] }
  0xb7   :  { %933 = vmatpush.msrb.mxu0 %v422_v32  ;;  %979 = vmatpush.msrb.mxu2 %v454_v33  ;;  %v440_v32 = vld [vmem:[#allocation2 + $0xb08] sm:$0xff]  ;;  %v457_v33 = vld [vmem:[#allocation2 + $0xb90] sm:$0xff] }
  0xb8   :  { %879 = vmatpush.msra.mxu1 %v359_v34  ;;  %925 = vmatpush.msra.mxu3 %v391_v35  ;;  %v407_v34 = vld [vmem:[#allocation2 + $0xa00] sm:$0xff]  ;;  %v424_v35 = vld [vmem:[#allocation2 + $0xa88] sm:$0xff] }
  0xb9   :  { %880 = vmatmul.f32.vlgmr.msra.gmra.mxu1 %v56_v36  ;;  %926 = vmatmul.f32.vlgmr.msra.gmra.mxu3 %v58_v37  ;;  %v439_v36 = vld [vmem:[#allocation2 + $0xb00] sm:$0xff]  ;;  %v456_v37 = vld [vmem:[#allocation2 + $0xb88] sm:$0xff] }
  0xba   :  { %934 = vmatpush.msrb.mxu0 %v421_v38  ;;  %956 = vmatpush.msrb.mxu1 %v438_v39  ;;  %v59_v38 = vld [vmem:[%s1495_s0 + $0xa0] sm:$0xff]  ;;  %v61_v39 = vld [vmem:[%s1495_s0 + $0xb0] sm:$0xff] }
  0xbb   :  { %980 = vmatpush.msrb.mxu2 %v453_v40  ;;  %1002 = vmatpush.msrb.mxu3 %v470_v41  ;;  %v423_v40 = vld [vmem:[#allocation2 + $0xa80] sm:$0xff] }
  0xbc   :  { %935 = vmatpush.msrb.mxu0 %v420_v42  ;;  %957 = vmatpush.msrb.mxu1 %v437_v43  ;;  %v455_v41 = vld [vmem:[#allocation2 + $0xb80] sm:$0xff]  ;;  %v60_v42 = vld [vmem:[%s1495_s0 + $0xa8] sm:$0xff]  ;;  %v62_v43 = vld [vmem:[%s1495_s0 + $0xb8] sm:$0xff] }
  0xbd   :  { %981 = vmatpush.msrb.mxu2 %v452_v44  ;;  %1003 = vmatpush.msrb.mxu3 %v469_v45  ;;  %v83_v44 = vld [vmem:[%s1495_s0 + $0x160] sm:$0xff]  ;;  %v85_v45 = vld [vmem:[%s1495_s0 + $0x170] sm:$0xff] }
  0xbe   :  { %936 = vmatpush.msrb.mxu0 %v419_v46  ;;  %958 = vmatpush.msrb.mxu1 %v436_v47  ;;  %v84_v46 = vld [vmem:[%s1495_s0 + $0x168] sm:$0xff]  ;;  %v86_v47 = vld [vmem:[%s1495_s0 + $0x178] sm:$0xff] }
  0xbf   :  { %982 = vmatpush.msrb.mxu2 %v451_v48  ;;  %1004 = vmatpush.msrb.mxu3 %v468_v49  ;;  %v490_v48 = vpop.f32.mrf.mxu0 }
  0xc0   :  { %860 = vmatmul.f32.gmra.mxu0 %v79_v50  ;;  %906 = vmatmul.f32.gmra.mxu2 %v81_v51  ;;  %v513_v49 = vpop.f32.mrf.mxu1 }
  0xc1   :  { %937 = vmatpush.msrb.mxu0 %v418_v52  ;;  %959 = vmatpush.msrb.mxu1 %v435_v53  ;;  %v536_v50 = vpop.f32.mrf.mxu2 }
  0xc2   :  { %983 = vmatpush.msrb.mxu2 %v450_v54  ;;  %1005 = vmatpush.msrb.mxu3 %v467_v55 }
  0xc3   :  { %883 = vmatmul.f32.gmra.mxu1 %v80_v56  ;;  %929 = vmatmul.f32.gmra.mxu3 %v82_v57  ;;  %v1178_v57 = vld [vmem:[%s1500_s5] ss:$0 sm:$0xff] }
  0xc4   :  { %938 = vmatpush.msrb.mxu0 %v417_v58  ;;  %960 = vmatpush.msrb.mxu1 %v434_v59  ;;  %v559_v51 = vpop.f32.mrf.mxu3 }
  0xc5   :  { %984 = vmatpush.msrb.mxu2 %v449_v60  ;;  %1006 = vmatpush.msrb.mxu3 %v466_v61  ;;  %v491_v60 = vadd.f32 %v1178_v57, %v490_v48 }
  0xc6   :  { %939 = vmatpush.msrb.mxu0 %v416_v62  ;;  %961 = vmatpush.msrb.mxu1 %v433_v63 }
  0xc7   :  { %985 = vmatpush.msrb.mxu2 %v448_v0  ;;  %1007 = vmatpush.msrb.mxu3 %v465_v1  ;;  %v493_v52 = vpop.f32.mrf.mxu0  ;;  %v514_v63 = vadd.f32 %v513_v49, %v491_v60  ;;  %v1029_v49 = vld [vmem:[%s1497_s2 + $0x10] sm:$0xff] }
  0xc8   :  { %940 = vmatpush.msrb.mxu0 %v415_v2  ;;  %962 = vmatpush.msrb.mxu1 %v432_v3  ;;  %v494_v0 = vadd.f32 %v1178_v57, %v493_v52  ;;  %v1028_v52 = vld [vmem:[%s1497_s2 + $0x8] sm:$0xff] }
  0xc9   :  { %986 = vmatpush.msrb.mxu2 %v447_v4  ;;  %1008 = vmatpush.msrb.mxu3 %v464_v5  ;;  %v537_v3 = vadd.f32 %v536_v50, %v514_v63 }
  0xca   :  { %941 = vmatpush.msrb.mxu0 %v414_v6  ;;  %963 = vmatpush.msrb.mxu1 %v431_v7  ;;  %v516_v53 = vpop.f32.mrf.mxu1  ;;  %v1042_v6 = vld [vmem:[%s1497_s2 + $0x78] sm:$0xff] }
  0xcb   :  { %987 = vmatpush.msrb.mxu2 %v446_v8  ;;  %1009 = vmatpush.msrb.mxu3 %v463_v9  ;;  %v539_v54 = vpop.f32.mrf.mxu2  ;;  %v517_v4 = vadd.f32 %v516_v53, %v494_v0  ;;  %v560_v7 = vadd.f32 %v559_v51, %v537_v3  ;;  %v1077_v3 = vld [vmem:[%s1498_s3 + $0x38] sm:$0xff] }
  0xcc   :  { %942 = vmatpush.msrb.mxu0 %v413_v10  ;;  %964 = vmatpush.msrb.mxu1 %v430_v11  ;;  %v1041_v10 = vld [vmem:[%s1497_s2 + $0x70] sm:$0xff] }
  0xcd   :  { %988 = vmatpush.msrb.mxu2 %v445_v12  ;;  %1010 = vmatpush.msrb.mxu3 %v462_v13  ;;  %v540_v8 = vadd.f32 %v539_v54, %v517_v4  ;;  %v1027_v54 = vld [vmem:[%s1497_s2] sm:$0xff]  ;;  %v1076_v4 = vld [vmem:[%s1498_s3 + $0x30] sm:$0xff] }
  0xce   :  { %943 = vmatpush.msrb.mxu0 %v412_v14  ;;  %965 = vmatpush.msrb.mxu1 %v429_v15  ;;  %v562_v55 = vpop.f32.mrf.mxu3  ;;  %v1040_v15 = vld [vmem:[%s1497_s2 + $0x68] sm:$0xff] }
  0xcf   :  { %989 = vmatpush.msrb.mxu2 %v444_v16  ;;  %1011 = vmatpush.msrb.mxu3 %v461_v17  ;;  %v563_v12 = vadd.f32 %v562_v55, %v540_v8  ;;  %v1039_v16 = vld [vmem:[%s1497_s2 + $0x60] sm:$0xff] }
  0xd0   :  { %944 = vmatpush.msrb.mxu0 %v411_v18  ;;  %966 = vmatpush.msrb.mxu1 %v428_v19  ;;  %v1038_v18 = vld [vmem:[%s1497_s2 + $0x58] sm:$0xff] }
  0xd1   :  { %990 = vmatpush.msrb.mxu2 %v443_v20  ;;  %1012 = vmatpush.msrb.mxu3 %v460_v21  ;;  %v582_v56 = vpop.f32.mrf.mxu0 }
  0xd2   :  { %945 = vmatpush.msrb.mxu0 %v410_v22  ;;  %967 = vmatpush.msrb.mxu1 %v427_v23  ;;  %v583_v13 = vadd.f32 %v582_v56, %v560_v7  ;;  %v1037_v22 = vld [vmem:[%s1497_s2 + $0x50] sm:$0xff]  ;;  %v1075_v7 = vld [vmem:[%s1498_s3 + $0x28] sm:$0xff] }
  0xd3   :  { %991 = vmatpush.msrb.mxu2 %v442_v24  ;;  %1013 = vmatpush.msrb.mxu3 %v459_v25  ;;  %v1036_v24 = vld [vmem:[%s1497_s2 + $0x48] sm:$0xff] }
  0xd4   :  { %946 = vmatpush.msrb.mxu0 %v409_v26  ;;  %968 = vmatpush.msrb.mxu1 %v426_v27  ;;  %v605_v58 = vpop.f32.mrf.mxu1  ;;  %v1035_v27 = vld [vmem:[%s1497_s2 + $0x40] sm:$0xff] }
  0xd5   :  { %992 = vmatpush.msrb.mxu2 %v441_v28  ;;  %1014 = vmatpush.msrb.mxu3 %v458_v29  ;;  %v628_v59 = vpop.f32.mrf.mxu2  ;;  %v606_v19 = vadd.f32 %v605_v58, %v583_v13  ;;  %v1034_v29 = vld [vmem:[%s1497_s2 + $0x38] sm:$0xff] }
  0xd6   :  { %947 = vmatpush.msrb.mxu0 %v408_v30  ;;  %969 = vmatpush.msrb.mxu1 %v425_v31 }
  0xd7   :  { %993 = vmatpush.msrb.mxu2 %v440_v32  ;;  %1015 = vmatpush.msrb.mxu3 %v457_v33  ;;  %v629_v25 = vadd.f32 %v628_v59, %v606_v19 }
  0xd8   :  { %948 = vmatpush.msrb.mxu0 %v407_v34  ;;  %970 = vmatpush.msrb.mxu1 %v424_v35  ;;  %v651_v61 = vpop.f32.mrf.mxu3 }
  0xd9   :  { %994 = vmatpush.msrb.mxu2 %v439_v36  ;;  %1016 = vmatpush.msrb.mxu3 %v456_v37  ;;  %v652_v30 = vadd.f32 %v651_v61, %v629_v25  ;;  %v1033_v37 = vld [vmem:[%s1497_s2 + $0x30] sm:$0xff] }
  0xda   :  { %949 = vmatmul.f32.vlgmr.msrb.gmra.mxu0 %v59_v38  ;;  %995 = vmatmul.f32.vlgmr.msrb.gmra.mxu2 %v61_v39  ;;  %v1032_v39 = vld [vmem:[%s1497_s2 + $0x28] sm:$0xff] }
  0xdb   :  { %971 = vmatpush.msrb.mxu1 %v423_v40  ;;  %1017 = vmatpush.msrb.mxu3 %v455_v41 }
  0xdc   :  { %972 = vmatmul.f32.vlgmr.msrb.gmra.mxu1 %v60_v42  ;;  %1018 = vmatmul.f32.vlgmr.msrb.gmra.mxu3 %v62_v43  ;;  %v1031_v43 = vld [vmem:[%s1497_s2 + $0x20] sm:$0xff] }
  0xdd   :  { %1045 = vmatpush.msra.mxu0 %v1042_v6  ;;  %1159 = vmatpush.msra.mxu3 %v1042_v6 }
  0xde   :  { %1095 = vmatpush.msra.mxu1 %v1077_v3 }
  0xdf   :  { %1046 = vmatpush.msra.mxu0 %v1041_v10  ;;  %1160 = vmatpush.msra.mxu3 %v1041_v10  ;;  %v1074_v10 = vld [vmem:[%s1498_s3 + $0x20] sm:$0xff] }
  0xe0   :  { %1096 = vmatpush.msra.mxu1 %v1076_v4 }
  0xe1   :  { %v585_v62 = vpop.f32.mrf.mxu0  ;;  %1047 = vmatpush.msra.mxu0 %v1040_v15  ;;  %1161 = vmatpush.msra.mxu3 %v1040_v15 }
  0xe2   :  { %952 = vmatmul.f32.gmra.mxu0 %v83_v44  ;;  %998 = vmatmul.f32.gmra.mxu2 %v85_v45  ;;  %v586_v20 = vadd.f32 %v585_v62, %v563_v12  ;;  %v1030_v45 = vld [vmem:[%s1497_s2 + $0x18] sm:$0xff] }
  0xe3   :  { %1048 = vmatpush.msra.mxu0 %v1039_v16  ;;  %1162 = vmatpush.msra.mxu3 %v1039_v16 }
  0xe4   :  { %975 = vmatmul.f32.gmra.mxu1 %v84_v46  ;;  %1021 = vmatmul.f32.gmra.mxu3 %v86_v47  ;;  %v608_v1 = vpop.f32.mrf.mxu1 }
  0xe5   :  { %1049 = vmatpush.msra.mxu0 %v1038_v18  ;;  %1163 = vmatpush.msra.mxu3 %v1038_v18  ;;  %v609_v26 = vadd.f32 %v608_v1, %v586_v20 }
  0xe6   :  { %1097 = vmatpush.msra.mxu1 %v1075_v7 }
  0xe7   :  { %v631_v2 = vpop.f32.mrf.mxu2  ;;  %1050 = vmatpush.msra.mxu0 %v1037_v22  ;;  %1164 = vmatpush.msra.mxu3 %v1037_v22 }
  0xe8   :  { %v632_v31 = vadd.f32 %v631_v2, %v609_v26  ;;  %1098 = vmatpush.msra.mxu1 %v1074_v10 }
  0xe9   :  { %1051 = vmatpush.msra.mxu0 %v1036_v24  ;;  %1165 = vmatpush.msra.mxu3 %v1036_v24 }
  0xea   :  { %v654_v5 = vpop.f32.mrf.mxu3 }
  0xeb   :  { %v674_v9 = vpop.f32.mrf.mxu0  ;;  %1052 = vmatpush.msra.mxu0 %v1035_v27  ;;  %1166 = vmatpush.msra.mxu3 %v1035_v27  ;;  %v655_v36 = vadd.f32 %v654_v5, %v632_v31 }
  0xec   :  { %v675_v34 = vadd.f32 %v674_v9, %v652_v30 }
  0xed   :  { %1053 = vmatpush.msra.mxu0 %v1034_v29  ;;  %1167 = vmatpush.msra.mxu3 %v1034_v29 }
  0xee   :  { %v697_v11 = vpop.f32.mrf.mxu1 }
  0xef   :  { %1054 = vmatpush.msra.mxu0 %v1033_v37  ;;  %1168 = vmatpush.msra.mxu3 %v1033_v37  ;;  %v698_v38 = vadd.f32 %v697_v11, %v675_v34 }
  0xf1   :  { %v720_v14 = vpop.f32.mrf.mxu2  ;;  %1055 = vmatpush.msra.mxu0 %v1032_v39  ;;  %1169 = vmatpush.msra.mxu3 %v1032_v39 }
  0xf2   :  { %v721_v41 = vadd.f32 %v720_v14, %v698_v38  ;;  %v1073_v14 = vld [vmem:[%s1498_s3 + $0x18] sm:$0xff] }
  0xf3   :  { %1056 = vmatpush.msra.mxu0 %v1031_v43  ;;  %1170 = vmatpush.msra.mxu3 %v1031_v43  ;;  %v1115_v43 = vld [vmem:[%s1499_s4 + $0x18] sm:$0xff] }
  0xf4   :  { %v743_v17 = vpop.f32.mrf.mxu3  ;;  %1099 = vmatpush.msra.mxu1 %v1073_v14  ;;  %1137 = vmatpush.msra.mxu2 %v1115_v43 }
  0xf5   :  { %1057 = vmatpush.msra.mxu0 %v1030_v45  ;;  %1171 = vmatpush.msra.mxu3 %v1030_v45  ;;  %v744_v47 = vadd.f32 %v743_v17, %v721_v41  ;;  %v1071_v41 = vld [vmem:[%s1498_s3 + $0x8] sm:$0xff]  ;;  %v1179_v45 = vld [vmem:[%s1500_s5 + $0x1] ss:$0 sm:$0xff] }
  0xf7   :  { %v677_v21 = vpop.f32.mrf.mxu0  ;;  %1058 = vmatpush.msra.mxu0 %v1029_v49  ;;  %1172 = vmatpush.msra.mxu3 %v1029_v49 }
  0xf8   :  { %v678_v42 = vadd.f32 %v677_v21, %v655_v36 }
  0xf9   :  { %1059 = vmatpush.msra.mxu0 %v1028_v52  ;;  %1173 = vmatpush.msra.mxu3 %v1028_v52  ;;  %v1113_v52 = vld [vmem:[%s1499_s4 + $0x8] sm:$0xff] }
  0xfa   :  { %v700_v23 = vpop.f32.mrf.mxu1 }
  0xfb   :  { %v723_v28 = vpop.f32.mrf.mxu2  ;;  %v701_v48 = vadd.f32 %v700_v23, %v678_v42  ;;  %1060 = vmatpush.msra.mxu0 %v1027_v54  ;;  %1174 = vmatpush.msra.mxu3 %v1027_v54  ;;  %v1070_v42 = vld [vmem:[%s1498_s3] sm:$0xff] }
  0xfc   :  { %v1180_v54 = vld [vmem:[%s1500_s5 + $0x2] ss:$0 sm:$0xff] }
  0xfd   :  { %v724_v53 = vadd.f32 %v723_v28, %v701_v48 }
  0xfe   :  { %v746_v32 = vpop.f32.mrf.mxu3 }
  0xff   :  { %v747_v59 = vadd.f32 %v746_v32, %v724_v53  ;;  %v1112_v53 = vld [vmem:[%s1499_s4] sm:$0xff] }
 0x10f   :  { %v766_v33 = vpop.f32.mrf.mxu0 }
 0x110   :  { %v767_v51 = vadd.f32 %v766_v33, %v744_v47 }
 0x112   :  { %v789_v35 = vpop.f32.mrf.mxu1 }
 0x113   :  { %v790_v56 = vadd.f32 %v789_v35, %v767_v51 }
 0x115   :  { %v812_v40 = vpop.f32.mrf.mxu2 }
 0x116   :  { %v813_v60 = vadd.f32 %v812_v40, %v790_v56  ;;  %v1072_v40 = vld [vmem:[%s1498_s3 + $0x10] sm:$0xff] }
 0x117   :  { %1100 = vmatpush.msra.mxu1 %v1072_v40 }
 0x118   :  { %v835_v44 = vpop.f32.mrf.mxu3 }
 0x119   :  { %v769_v46 = vpop.f32.mrf.mxu0  ;;  %v836_v63 = vadd.f32 %v835_v44, %v813_v60  ;;  %1101 = vmatpush.msra.mxu1 %v1071_v41  ;;  %v1114_v44 = vld [vmem:[%s1499_s4 + $0x10] sm:$0xff] }
 0x11a   :  { %v770_v62 = vadd.f32 %v769_v46, %v747_v59  ;;  %1138 = vmatpush.msra.mxu2 %v1114_v44 }
 0x11b   :  { %1102 = vmatpush.msra.mxu1 %v1070_v42 }
 0x11c   :  { %v792_v50 = vpop.f32.mrf.mxu1  ;;  %1139 = vmatpush.msra.mxu2 %v1113_v52 }
 0x11d   :  { %v793_v1 = vadd.f32 %v792_v50, %v770_v62 }
 0x11e   :  { %1140 = vmatpush.msra.mxu2 %v1112_v53 }
 0x11f   :  { %v815_v55 = vpop.f32.mrf.mxu2 }
 0x120   :  { %v816_v6 = vadd.f32 %v815_v55, %v793_v1 }
 0x122   :  { %v838_v57 = vpop.f32.mrf.mxu3 }
 0x123   :  { %v839_v12 = vadd.f32 %v838_v57, %v816_v6 }
 0x133   :  { %v858_v58 = vpop.f32.mrf.mxu0 }
 0x134   :  { %v859_v2 = vadd.f32 %v858_v58, %v836_v63 }
 0x136   :  { %v881_v61 = vpop.f32.mrf.mxu1 }
 0x137   :  { %v882_v9 = vadd.f32 %v881_v61, %v859_v2  ;;  %v1181_v61 = vld [vmem:[%s1500_s5 + $0x3] ss:$0 sm:$0xff] }
 0x139   :  { %v904_v0 = vpop.f32.mrf.mxu2 }
 0x13a   :  { %v905_v13 = vadd.f32 %v904_v0, %v882_v9 }
 0x13c   :  { %v927_v5 = vpop.f32.mrf.mxu3 }
 0x13d   :  { %v861_v8 = vpop.f32.mrf.mxu0  ;;  %v928_v17 = vadd.f32 %v927_v5, %v905_v13 }
 0x13e   :  { %v862_v15 = vadd.f32 %v861_v8, %v839_v12 }
 0x140   :  { %v884_v11 = vpop.f32.mrf.mxu1 }
 0x141   :  { %v885_v20 = vadd.f32 %v884_v11, %v862_v15 }
 0x143   :  { %v907_v16 = vpop.f32.mrf.mxu2 }
 0x144   :  { %v908_v23 = vadd.f32 %v907_v16, %v885_v20 }
 0x146   :  { %v930_v18 = vpop.f32.mrf.mxu3 }
 0x147   :  { %v931_v26 = vadd.f32 %v930_v18, %v908_v23 }
 0x157   :  { %v950_v19 = vpop.f32.mrf.mxu0 }
 0x158   :  { %v951_v21 = vadd.f32 %v950_v19, %v928_v17 }
 0x159   :  { %v973_v22 = vpop.f32.mrf.mxu1 }
 0x15a   :  { %v974_v24 = vadd.f32 %v973_v22, %v951_v21 }
 0x15d   :  { %v996_v25 = vpop.f32.mrf.mxu2 }
 0x15e   :  { %v997_v27 = vadd.f32 %v996_v25, %v974_v24 }
 0x15f   :  { %v953_v28 = vpop.f32.mrf.mxu0  ;;  %v1019_v29 = vpop.f32.mrf.mxu3 }
 0x160   :  { %v954_v30 = vadd.f32 %v953_v28, %v931_v26  ;;  %v1020_v31 = vadd.f32 %v1019_v29, %v997_v27 }
 0x161   :  { %v976_v32 = vpop.f32.mrf.mxu1 }
 0x162   :  { %v1025_v33 = vmax.f32 %v1020_v31, 0.0  ;;  %v977_v34 = vadd.f32 %v976_v32, %v954_v30 }
 0x164   :  { %1061 = vmatmul.f32.vlgmr.msra.gmra.mxu0 %v1025_v33 }
 0x165   :  { %v999_v35 = vpop.f32.mrf.mxu2 }
 0x166   :  { %v1000_v36 = vadd.f32 %v999_v35, %v977_v34 }
 0x167   :  { %v1022_v37 = vpop.f32.mrf.mxu3 }
 0x168   :  { %v1023_v38 = vadd.f32 %v1022_v37, %v1000_v36 }
 0x16a   :  { %v1026_v39 = vmax.f32 %v1023_v38, 0.0 }
 0x16c   :  { %1064 = vmatmul.f32.vlgmr.msra.gmra.mxu3 %v1026_v39 }
 0x1e1   :  { %v1062_v46 = vpop.f32.mrf.mxu0 }
 0x1e2   :  { %v1063_v47 = vadd.f32 %v1179_v45, %v1062_v46 }
 0x1e4   :  { %v1068_v48 = vmax.f32 %v1063_v47, 0.0 }
 0x1e6   :  { %1155 = vmatmul.msk.f32.vlgmr.msra.gmra.mxu1 %vm1080_vm0, %v1068_v48 }
 0x1ef   :  { %v1065_v49 = vpop.f32.mrf.mxu3 }
 0x1f0   :  { %v1066_v50 = vadd.f32 %v1179_v45, %v1065_v49 }
 0x1f2   :  { %v1069_v51 = vmax.f32 %v1066_v50, 0.0 }
 0x1f4   :  { %1156 = vmatmul.msk.f32.gmra.mxu1 %vm1080_vm0, %v1069_v51 }
 0x263   :  { %v1104_v55 = vpop.f32.mrf.mxu1 }
 0x264   :  { %v1105_v56 = vadd.f32 %v1180_v54, %v1104_v55 }
 0x266   :  { %v1110_v57 = vmax.f32 %v1105_v56, 0.0 }
 0x268   :  { %1157 = vmatmul.msk.f32.vlgmr.msra.gmra.mxu2 %vm1118_vm1, %v1110_v57 }
 0x271   :  { %v1107_v58 = vpop.f32.mrf.mxu1 }
 0x272   :  { %v1108_v59 = vadd.f32 %v1180_v54, %v1107_v58 }
 0x274   :  { %v1111_v60 = vmax.f32 %v1108_v59, 0.0 }
 0x276   :  { %1158 = vmatmul.msk.f32.gmra.mxu2 %vm1118_vm1, %v1111_v60 }
 0x2eb   :  { %v1142_v62 = vpop.f32.mrf.mxu2 }
 0x2ec   :  { %v1143_v63 = vadd.f32 %v1181_v61, %v1142_v62 }
 0x2ee   :  { %1148 = vst [vmem:[%s1501_s6] sm:$0xff] %v1143_v63 }
 0x2f9   :  { %v1145_v0 = vpop.f32.mrf.mxu2 }
 0x2fa   :  { %v1146_v1 = vadd.f32 %v1181_v61, %v1145_v0 }
 0x2fc   :  { %1149 = vst [vmem:[%s1501_s6 + $0x8] sm:$0xff] %v1146_v1 }
 0x2fd   :  { %1154 = vsyncpa [#allocation3], 1 }

</bundles_post_ra>
